<compile_context>
chip_gen: v7x
topology: tpu7x:2x2x1
jax: 0.10.0
libtpu: 0.0.40
codegen_flags: <defaults>
</compile_context>

<pallas_src>
import jax
import jax.numpy as jnp
from jax.experimental import pallas as pl
from jax.experimental.pallas import tpu as pltpu

H1, H2 = 800, 600          # hidden sizes fixed by the PyTorch module
LANE = 128                 # TPU lane width
SUBLANE = 8                # TPU sublane granule (f32)
TB_MAX = 1024              # max batch-tile rows (review: 512-1024)


def _round_up(x, m):
    return ((x + m - 1) // m) * m


def actor_kernel(s_ref, w1_ref, b1_ref, w2_ref, b2_ref, w3_ref, b3_ref, out_ref):
    # bf16 into the MXU, f32 accumulation.  Bias+ReLU run in the biases' dtype
    # (bf16 on v6e/v7x halves VALU passes + intermediate footprint; pass f32
    # biases for the v5e-friendly path).
    s = s_ref[...].astype(jnp.bfloat16)

    # layer 1: (TB, S) @ (S, H1) + (1, H1) -> relu
    h1 = jnp.dot(s, w1_ref[...], preferred_element_type=jnp.float32)
    h1 = jnp.maximum(h1.astype(b1_ref.dtype) + b1_ref[...], 0.0)

    # layer 2: (TB, H1) @ (H1, H2) + (1, H2) -> relu
    h2 = jnp.dot(h1.astype(jnp.bfloat16), w2_ref[...],
                 preferred_element_type=jnp.float32)
    h2 = jnp.maximum(h2.astype(b2_ref.dtype) + b2_ref[...], 0.0)

    # layer 3: (TB, H2) @ (H2, A_pad) + (1, A_pad) -> tanh (lane-dense store)
    a = jnp.dot(h2.astype(jnp.bfloat16), w3_ref[...],
                preferred_element_type=jnp.float32)
    out_ref[...] = jnp.tanh(a + b3_ref[...]).astype(out_ref.dtype)


def init_actor_params(key, state_dim, action_dim):
    """f32 params mimicking nn.Linear's U(-1/sqrt(fan_in), 1/sqrt(fan_in))."""
    dims = [(state_dim, H1), (H1, H2), (H2, action_dim)]
    params = {}
    for i, (fin, fout) in enumerate(dims, start=1):
        key, kw, kb = jax.random.split(key, 3)
        bound = 1.0 / jnp.sqrt(jnp.float32(fin))
        params[f"W{i}"] = jax.random.uniform(
            kw, (fin, fout), jnp.float32, minval=-bound, maxval=bound)
        # biases kept 2-D (1, fout) so they broadcast cleanly inside the kernel
        params[f"b{i}"] = jax.random.uniform(
            kb, (1, fout), jnp.float32, minval=-bound, maxval=bound)
    return params


def prepare_actor_params(params, *, elemwise_dtype=jnp.bfloat16, pad_hidden=False):
    """One-time prep.

    - weights cast to bf16 (halves weight DMA); dots still accumulate in f32.
    - layer-3 output padded to a lane-dense 128-wide tile (unmasked final vst).
    - b1/b2 stored in `elemwise_dtype` (bf16 default -> bias/ReLU on bf16
      vregs on v6e/v7x; pass jnp.float32 for the v5e-friendly path).
    - pad_hidden=True additionally zero-pads hidden widths to lane multiples
      (800->896, 600->640) so all intermediates are lane-dense.  Worth it for
      the large-batch/throughput case; skip it for tiny DMA-bound batches.
    """
    action_dim = params["W3"].shape[1]
    out_lanes = _round_up(action_dim, LANE)
    h1p = _round_up(H1, LANE) if pad_hidden else H1
    h2p = _round_up(H2, LANE) if pad_hidden else H2

    w1 = jnp.pad(params["W1"], ((0, 0), (0, h1p - H1)))
    b1 = jnp.pad(params["b1"], ((0, 0), (0, h1p - H1)))
    w2 = jnp.pad(params["W2"], ((0, h1p - H1), (0, h2p - H2)))
    b2 = jnp.pad(params["b2"], ((0, 0), (0, h2p - H2)))
    w3 = jnp.pad(params["W3"], ((0, h2p - H2), (0, out_lanes - action_dim)))
    b3 = jnp.pad(params["b3"], ((0, 0), (0, out_lanes - action_dim)))

    return {
        "W1": w1.astype(jnp.bfloat16),
        "b1": b1.astype(elemwise_dtype),
        "W2": w2.astype(jnp.bfloat16),
        "b2": b2.astype(elemwise_dtype),
        "W3": w3.astype(jnp.bfloat16),
        "b3": b3.astype(jnp.float32),    # final bias / tanh stay f32
        "action_dim": action_dim,
    }


def _choose_tiling(B):
    """Tail-aware batch tiling.

    - B <= 8: one sublane-rounded tile (can't be split below 8 rows anyway).
    - otherwise: smallest tile count keeping TB <= TB_MAX, but at least 2
      tiles so the "parallel" grid axis gives v7x's second TensorCore work;
      the tile is rounded to the 8-row sublane granule, which minimizes tail
      padding (e.g. B=300 -> 2 x 152 instead of 2 x 256).
    Returns (TB, B_pad).
    """
    if B <= SUBLANE:
        tb = _round_up(B, SUBLANE)
        return tb, tb
    n = max(-(-B // TB_MAX), 2)
    tb = _round_up(-(-B // n), SUBLANE)
    return tb, n * tb


def actor_forward(s, prepared, *, out_dtype=jnp.float32):
    """s: (batch, state_dim) float32. prepared: dict from prepare_actor_params."""
    B, state_dim = s.shape
    action_dim = prepared["action_dim"]
    out_lanes = prepared["W3"].shape[1]

    TB, B_pad = _choose_tiling(B)
    if B_pad != B:
        s = jnp.pad(s, ((0, B_pad - B), (0, 0)))

    grid = (B_pad // TB,)

    def const(i):               # weights/biases: same block every step -> resident
        return (0, 0)

    out = pl.pallas_call(
        actor_kernel,
        out_shape=jax.ShapeDtypeStruct((B_pad, out_lanes), out_dtype),
        grid=grid,
        in_specs=[
            pl.BlockSpec((TB, state_dim), lambda i: (i, 0)),     # streamed
            pl.BlockSpec(prepared["W1"].shape, const),
            pl.BlockSpec(prepared["b1"].shape, const),
            pl.BlockSpec(prepared["W2"].shape, const),
            pl.BlockSpec(prepared["b2"].shape, const),
            pl.BlockSpec(prepared["W3"].shape, const),
            pl.BlockSpec(prepared["b3"].shape, const),
        ],
        out_specs=pl.BlockSpec((TB, out_lanes), lambda i: (i, 0)),
        compiler_params=pltpu.CompilerParams(
            dimension_semantics=("parallel",),    # v7x: shard tiles across 2 TCs
            vmem_limit_bytes=48 * 1024 * 1024),   # TB=1024 fits under v5e default
    )(s, prepared["W1"], prepared["b1"], prepared["W2"], prepared["b2"],
      prepared["W3"], prepared["b3"])

    return out[:B, :action_dim]


# --- references ---------------------------------------------------------------

def actor_reference_f32(s, params):
    """Pure-f32 PyTorch-equivalent forward."""
    h1 = jnp.maximum(s @ params["W1"] + params["b1"], 0.0)
    h2 = jnp.maximum(h1 @ params["W2"] + params["b2"], 0.0)
    return jnp.tanh(h2 @ params["W3"] + params["b3"])


def actor_reference_bf16(s, params, elemwise_dtype=jnp.bfloat16):
    """Replicates the kernel's bf16-weight / f32-accumulate / bf16-elementwise math."""
    w1 = params["W1"].astype(jnp.bfloat16)
    w2 = params["W2"].astype(jnp.bfloat16)
    w3 = params["W3"].astype(jnp.bfloat16)
    b1 = params["b1"].astype(elemwise_dtype)
    b2 = params["b2"].astype(elemwise_dtype)
    h1 = jnp.dot(s.astype(jnp.bfloat16), w1, preferred_element_type=jnp.float32)
    h1 = jnp.maximum(h1.astype(elemwise_dtype) + b1, 0.0)
    h2 = jnp.dot(h1.astype(jnp.bfloat16), w2, preferred_element_type=jnp.float32)
    h2 = jnp.maximum(h2.astype(elemwise_dtype) + b2, 0.0)
    a = jnp.dot(h2.astype(jnp.bfloat16), w3,
                preferred_element_type=jnp.float32) + params["b3"]
    return jnp.tanh(a)


if __name__ == "__main__":
    key = jax.random.PRNGKey(0)
    batch, state_dim, action_dim = 2, 24, 2   # typical TD3 nav: 20 laser + 4 robot state

    key, ks = jax.random.split(key)
    s = jax.random.normal(ks, (batch, state_dim), jnp.float32)
    params = init_actor_params(key, state_dim, action_dim)
    prepared = prepare_actor_params(params)

    # Tiny-batch (acting) path: single 8-row tile.
    out = actor_forward(s, prepared)
    jax.block_until_ready(out)
    assert out.shape == (batch, action_dim)

    ref_bf16 = actor_reference_bf16(s, params)
    ref_f32 = actor_reference_f32(s, params)
    assert jnp.allclose(out, ref_bf16, atol=2e-3, rtol=2e-3), "mismatch vs bf16 reference"
    assert jnp.allclose(out, ref_f32, atol=4e-2, rtol=4e-2), "mismatch vs f32 reference"

    # Multi-tile grid path (tail-aware: 300 rows -> 2 tiles of 152).
    key, kb = jax.random.split(key)
    s_big = jax.random.normal(kb, (300, state_dim), jnp.float32)
    out_big = actor_forward(s_big, prepared)
    jax.block_until_ready(out_big)
    assert out_big.shape == (300, action_dim)
    ref_big = actor_reference_bf16(s_big, params)
    assert jnp.allclose(out_big, ref_big, atol=2e-3, rtol=2e-3), \
        "mismatch vs bf16 reference (batched)"

    # Throughput options: lane-padded hidden widths + bf16 output store.
    prepared_pad = prepare_actor_params(params, pad_hidden=True)
    out_pad = actor_forward(s_big, prepared_pad, out_dtype=jnp.bfloat16)
    jax.block_until_ready(out_pad)
    assert out_pad.shape == (300, action_dim)
    assert jnp.allclose(out_pad.astype(jnp.float32), ref_big, atol=1e-2, rtol=1e-2), \
        "mismatch vs bf16 reference (padded hidden / bf16 out)"

    print("KERNEL_OK")
</pallas_src>

<mosaic_0001>
module attributes {stable_mosaic.version = 11 : i64} {
  func.func @actor_kernel(%arg0: i32, %arg1: memref<8x24xf32, #tpu.memory_space<vmem>>, %arg2: memref<24x800xbf16, #tpu.memory_space<vmem>>, %arg3: memref<1x800xbf16, #tpu.memory_space<vmem>>, %arg4: memref<800x600xbf16, #tpu.memory_space<vmem>>, %arg5: memref<1x600xbf16, #tpu.memory_space<vmem>>, %arg6: memref<600x128xbf16, #tpu.memory_space<vmem>>, %arg7: memref<1x128xf32, #tpu.memory_space<vmem>>, %arg8: memref<8x128xf32, #tpu.memory_space<vmem>>) attributes {dimension_semantics = [#tpu.dimension_semantics<parallel>], iteration_bounds = array<i64: 1>, scalar_prefetch = 0 : i64, scratch_operands = 0 : i64, tpu.core_type = #tpu.core_type<tc>, window_params = [{transform_indices = @transform_0, window_bounds = array<i64: 8, 24>}, {pipeline_mode = #tpu.pipeline_mode<synchronous>, transform_indices = @transform_1, window_bounds = array<i64: 24, 800>}, {pipeline_mode = #tpu.pipeline_mode<synchronous>, transform_indices = @transform_2, window_bounds = array<i64: 1, 800>}, {pipeline_mode = #tpu.pipeline_mode<synchronous>, transform_indices = @transform_3, window_bounds = array<i64: 800, 600>}, {pipeline_mode = #tpu.pipeline_mode<synchronous>, transform_indices = @transform_4, window_bounds = array<i64: 1, 600>}, {pipeline_mode = #tpu.pipeline_mode<synchronous>, transform_indices = @transform_5, window_bounds = array<i64: 600, 128>}, {pipeline_mode = #tpu.pipeline_mode<synchronous>, transform_indices = @transform_6, window_bounds = array<i64: 1, 128>}, {transform_indices = @transform_7, window_bounds = array<i64: 8, 128>}]} {
    %c0 = arith.constant 0 : index
    %c0_0 = arith.constant 0 : index
    %0 = vector.load %arg1[%c0, %c0_0] : memref<8x24xf32, #tpu.memory_space<vmem>>, vector<8x24xf32>
    %1 = arith.truncf %0 : vector<8x24xf32> to vector<8x24xbf16>
    %c0_1 = arith.constant 0 : index
    %c0_2 = arith.constant 0 : index
    %2 = vector.load %arg2[%c0_1, %c0_2] : memref<24x800xbf16, #tpu.memory_space<vmem>>, vector<24x800xbf16>
    %cst = arith.constant dense<0.000000e+00> : vector<8x800xf32>
    %3 = tpu.matmul %1, %2, %cst {dimension_numbers = #tpu.dot_dimension_numbers<[1], [0], [0], [1], [0, 0, 1, 1], [], []>} : vector<8x24xbf16>, vector<24x800xbf16>, vector<8x800xf32> -> vector<8x800xf32>
    %4 = arith.truncf %3 : vector<8x800xf32> to vector<8x800xbf16>
    %c0_3 = arith.constant 0 : index
    %c0_4 = arith.constant 0 : index
    %5 = vector.load %arg3[%c0_3, %c0_4] : memref<1x800xbf16, #tpu.memory_space<vmem>>, vector<1x800xbf16>
    %6 = vector.broadcast %5 : vector<1x800xbf16> to vector<8x800xbf16>
    %7 = arith.addf %4, %6 : vector<8x800xbf16>
    %cst_5 = arith.constant 0.000000e+00 : bf16
    %8 = vector.broadcast %cst_5 : bf16 to vector<8x800xbf16>
    %9 = arith.maximumf %7, %8 : vector<8x800xbf16>
    %c0_6 = arith.constant 0 : index
    %c0_7 = arith.constant 0 : index
    %10 = vector.load %arg4[%c0_6, %c0_7] : memref<800x600xbf16, #tpu.memory_space<vmem>>, vector<800x600xbf16>
    %cst_8 = arith.constant dense<0.000000e+00> : vector<8x600xf32>
    %11 = tpu.matmul %9, %10, %cst_8 {dimension_numbers = #tpu.dot_dimension_numbers<[1], [0], [0], [1], [0, 0, 1, 1], [], []>} : vector<8x800xbf16>, vector<800x600xbf16>, vector<8x600xf32> -> vector<8x600xf32>
    %12 = arith.truncf %11 : vector<8x600xf32> to vector<8x600xbf16>
    %c0_9 = arith.constant 0 : index
    %c0_10 = arith.constant 0 : index
    %13 = vector.load %arg5[%c0_9, %c0_10] : memref<1x600xbf16, #tpu.memory_space<vmem>>, vector<1x600xbf16>
    %14 = vector.broadcast %13 : vector<1x600xbf16> to vector<8x600xbf16>
    %15 = arith.addf %12, %14 : vector<8x600xbf16>
    %cst_11 = arith.constant 0.000000e+00 : bf16
    %16 = vector.broadcast %cst_11 : bf16 to vector<8x600xbf16>
    %17 = arith.maximumf %15, %16 : vector<8x600xbf16>
    %c0_12 = arith.constant 0 : index
    %c0_13 = arith.constant 0 : index
    %18 = vector.load %arg6[%c0_12, %c0_13] : memref<600x128xbf16, #tpu.memory_space<vmem>>, vector<600x128xbf16>
    %cst_14 = arith.constant dense<0.000000e+00> : vector<8x128xf32>
    %19 = tpu.matmul %17, %18, %cst_14 {dimension_numbers = #tpu.dot_dimension_numbers<[1], [0], [0], [1], [0, 0, 1, 1], [], []>} : vector<8x600xbf16>, vector<600x128xbf16>, vector<8x128xf32> -> vector<8x128xf32>
    %c0_15 = arith.constant 0 : index
    %c0_16 = arith.constant 0 : index
    %20 = vector.load %arg7[%c0_15, %c0_16] : memref<1x128xf32, #tpu.memory_space<vmem>>, vector<1x128xf32>
    %21 = vector.broadcast %20 : vector<1x128xf32> to vector<8x128xf32>
    %22 = arith.addf %19, %21 : vector<8x128xf32>
    %23 = math.tanh %22 : vector<8x128xf32>
    %c0_17 = arith.constant 0 : index
    %c0_18 = arith.constant 0 : index
    %24 = vector.load %arg8[%c0_17, %c0_18] : memref<8x128xf32, #tpu.memory_space<vmem>>, vector<8x128xf32>
    tpu.vector_store %arg8[%c0_17, %c0_18], %23 {strides = array<i32>} : memref<8x128xf32, #tpu.memory_space<vmem>>, vector<8x128xf32>,
    return
  }
  func.func @transform_0(%arg0: i32) -> (i32, i32) {
    %c0_i32 = arith.constant 0 : i32
    %c0_i32_0 = arith.constant 0 : i32
    return %arg0, %c0_i32 : i32, i32
  }
  func.func @transform_1(%arg0: i32) -> (i32, i32) {
    %c0_i32 = arith.constant 0 : i32
    %c0_i32_0 = arith.constant 0 : i32
    %c0_i32_1 = arith.constant 0 : i32
    return %c0_i32, %c0_i32_0 : i32, i32
  }
  func.func @transform_2(%arg0: i32) -> (i32, i32) {
    %c0_i32 = arith.constant 0 : i32
    %c0_i32_0 = arith.constant 0 : i32
    %c0_i32_1 = arith.constant 0 : i32
    return %c0_i32, %c0_i32_0 : i32, i32
  }
  func.func @transform_3(%arg0: i32) -> (i32, i32) {
    %c0_i32 = arith.constant 0 : i32
    %c0_i32_0 = arith.constant 0 : i32
    %c0_i32_1 = arith.constant 0 : i32
    return %c0_i32, %c0_i32_0 : i32, i32
  }
  func.func @transform_4(%arg0: i32) -> (i32, i32) {
    %c0_i32 = arith.constant 0 : i32
    %c0_i32_0 = arith.constant 0 : i32
    %c0_i32_1 = arith.constant 0 : i32
    return %c0_i32, %c0_i32_0 : i32, i32
  }
  func.func @transform_5(%arg0: i32) -> (i32, i32) {
    %c0_i32 = arith.constant 0 : i32
    %c0_i32_0 = arith.constant 0 : i32
    %c0_i32_1 = arith.constant 0 : i32
    return %c0_i32, %c0_i32_0 : i32, i32
  }
  func.func @transform_6(%arg0: i32) -> (i32, i32) {
    %c0_i32 = arith.constant 0 : i32
    %c0_i32_0 = arith.constant 0 : i32
    %c0_i32_1 = arith.constant 0 : i32
    return %c0_i32, %c0_i32_0 : i32, i32
  }
  func.func @transform_7(%arg0: i32) -> (i32, i32) {
    %c0_i32 = arith.constant 0 : i32
    %c0_i32_0 = arith.constant 0 : i32
    return %arg0, %c0_i32 : i32, i32
  }
}

</mosaic_0001>

<bundles_post_ra>
// kernel: tpu_custom_call.1
= control target key start
LH: loop header
LB: loop body
LE: loop exit
PB: predicated region body
PF: predicated region fallthrough
CT: control target
= control target key end

     0   :  { %12 = vsyncpa [#allocation3], 0  ;;  %s4393_s0 = inlined_call_operand.hbm [shape: f32[8,24], index: 0, kind: input, shape index: {}]   ;;  %s4394_s1 = inlined_call_operand.hbm [shape: bf16[24,800], index: 1, kind: input, shape index: {}]   ;;  %s4395_s2 = inlined_call_operand.vmem [shape: bf16[1,800], index: 2, kind: input, shape index: {}]   ;;  %s4396_s3 = inlined_call_operand.hbm [shape: bf16[800,600], index: 3, kind: input, shape index: {}]   ;;  %s4397_s4 = inlined_call_operand.vmem [shape: bf16[1,600], index: 4, kind: input, shape index: {}]   ;;  %s4398_s5 = inlined_call_operand.hbm [shape: bf16[600,128], index: 5, kind: input, shape index: {}]   ;;  %s4399_s6 = inlined_call_operand.vmem [shape: f32[1,128], index: 6, kind: input, shape index: {}]   ;;  %s4400_s7 = inlined_call_operand.hbm [shape: f32[8,128], index: 7, kind: output, shape index: {}]  }
   0x1   :  { %13 = vsyncpa [#allocation6], 0 }
   0x2   :  { %14 = vsyncpa [#allocation9], 0 }
   0x3   :  { %15 = vsyncpa [#allocation4], 0  ;;  %s4129_s24 = smov [#allocation5]   ;;  %s4011_s28 = scalar_lea.hbm %s4394_s1, 1344 }
   0x4   :  { %s31_s25 = sshll.u32 %s4129_s24, 4  ;;  %p4012_p0 = scmp.ne.s32.totalorder %s4394_s1, %s4011_s28  ;;  %s32_s25 = int_to_ptr.vmem [resolvable:$true] %s31_s25 }
   0x5   :  { %p4015_p1 = scmp.lt.u32.totalorder %s4011_s28, %s4394_s1 }
   0x7   :  { %p4017_p2 = pnand %p4015_p1, %p4012_p0 }
   0x9   :  { %4020 = shalt.err (!%p4017_p2)
}
   0xa   :  { %s4021_s10 = scalar_lea.vmem %s32_s25, 1344  ;;  %p4026_p4 = scmp.lt.s32.totalorder %s32_s25, %s32_s25 }
   0xb   :  { %p4022_p3 = scmp.ne.s32.totalorder %s32_s25, %s4021_s10  ;;  %p4027_p5 = scmp.lt.s32.totalorder %s4021_s10, %s4021_s10 }
   0xd   :  { %p4028_p6 = por %p4027_p5, %p4026_p4 }
   0xf   :  { %p4029_p7 = pnand %p4028_p6, %p4022_p3 }
  0x11   :  { %4032 = shalt.err (!%p4029_p7)
}
  0x12   :  { %s4130_s11 = smov 448   ;;  %s4131_s12 = smov 28  }
  0x13   :  { %37 = dma.hbm_to_vmem [thread:$0]  %s4394_s1, 1344, %s32_s25, [#allocation6], %s4130_s11, %s4130_s11, %s4131_s12  }
  0x14   :  { %s4132_s15 = smov [#allocation2]   ;;  %s4133_s17 = smov [#allocation7]  }
  0x15   :  { %s22_s16 = sshll.u32 %s4132_s15, 4  ;;  %s45_s18 = sshll.u32 %s4133_s17, 4  ;;  %s23_s16 = int_to_ptr.vmem [resolvable:$true] %s22_s16  ;;  %s46_s18 = int_to_ptr.vmem [resolvable:$true] %s45_s18 }
  0x16   :  { %s4033_s21 = scalar_lea.hbm %s4393_s0, 128 }
  0x17   :  { %p4034_p8 = scmp.ne.s32.totalorder %s4393_s0, %s4033_s21  ;;  %p4037_p9 = scmp.lt.u32.totalorder %s4033_s21, %s4393_s0 }
  0x19   :  { %p4039_p10 = pnand %p4037_p9, %p4034_p8 }
  0x1b   :  { %4042 = shalt.err (!%p4039_p10)
}
  0x1c   :  { %s4043_s1 = scalar_lea.vmem %s23_s16, 128  ;;  %p4048_p12 = scmp.lt.s32.totalorder %s23_s16, %s23_s16 }
  0x1d   :  { %p4044_p11 = scmp.ne.s32.totalorder %s23_s16, %s4043_s1  ;;  %p4049_p13 = scmp.lt.s32.totalorder %s4043_s1, %s4043_s1 }
  0x1f   :  { %p4050_p0 = por %p4049_p13, %p4048_p12 }
  0x21   :  { %p4051_p1 = pnand %p4050_p0, %p4044_p11 }
  0x23   :  { %4054 = shalt.err (!%p4051_p1)
}
  0x24   :  { %25 = dma.hbm_to_vmem [thread:$0]  %s4393_s0, 128, %s23_s16, [#allocation3]  }
  0x25   :  { %s4055_s30 = scalar_lea.hbm %s4396_s3, 32000 }
  0x26   :  { %p4056_p2 = scmp.ne.s32.totalorder %s4396_s3, %s4055_s30  ;;  %p4059_p3 = scmp.lt.u32.totalorder %s4055_s30, %s4396_s3 }
  0x28   :  { %p4061_p4 = pnand %p4059_p3, %p4056_p2 }
  0x2a   :  { %4064 = shalt.err (!%p4061_p4)
}
  0x2b   :  { %s4065_s12 = scalar_lea.vmem %s46_s18, 32000  ;;  %p4070_p6 = scmp.lt.s32.totalorder %s46_s18, %s46_s18 }
  0x2c   :  { %p4066_p5 = scmp.ne.s32.totalorder %s46_s18, %s4065_s12  ;;  %p4071_p7 = scmp.lt.s32.totalorder %s4065_s12, %s4065_s12 }
  0x2e   :  { %p4072_p8 = por %p4071_p7, %p4070_p6 }
  0x30   :  { %p4073_p9 = pnand %p4072_p8, %p4066_p5 }
  0x32   :  { %4076 = shalt.err (!%p4073_p9)
}
  0x33   :  { %s4134_s0 = smov 320   ;;  %s4135_s13 = smov 20  }
  0x34   :  { %51 = dma.hbm_to_vmem [thread:$0]  %s4396_s3, 32000, %s46_s18, [#allocation6], %s4134_s0, %s4134_s0, %s4135_s13  }
  0x35   :  { %s4136_s16 = smov [#allocation8]   ;;  %s4077_s21 = scalar_lea.hbm %s4398_s5, 4800 }
  0x36   :  { %s59_s17 = sshll.u32 %s4136_s16, 4  ;;  %p4078_p10 = scmp.ne.s32.totalorder %s4398_s5, %s4077_s21  ;;  %s60_s17 = int_to_ptr.vmem [resolvable:$true] %s59_s17 }
  0x37   :  { %p4081_p11 = scmp.lt.u32.totalorder %s4077_s21, %s4398_s5 }
  0x39   :  { %p4083_p12 = pnand %p4081_p11, %p4078_p10 }
  0x3b   :  { %4086 = shalt.err (!%p4083_p12)
}
  0x3c   :  { %s4087_s1 = scalar_lea.vmem %s60_s17, 4800  ;;  %p4092_p0 = scmp.lt.s32.totalorder %s60_s17, %s60_s17 }
  0x3d   :  { %p4088_p13 = scmp.ne.s32.totalorder %s60_s17, %s4087_s1  ;;  %p4093_p1 = scmp.lt.s32.totalorder %s4087_s1, %s4087_s1 }
  0x3f   :  { %p4094_p2 = por %p4093_p1, %p4092_p0 }
  0x41   :  { %p4095_p3 = pnand %p4094_p2, %p4088_p13 }
  0x43   :  { %4098 = shalt.err (!%p4095_p3)
}
  0x44   :  { %s4137_s3 = smov 64   ;;  %s4138_s18 = smov 4  }
  0x45   :  { %65 = dma.hbm_to_vmem [thread:$0]  %s4398_s5, 4800, %s60_s17, [#allocation9], %s4137_s3, %s4137_s3, %s4138_s18  }
  0x46   :  { %4121 = dma.done.wait [#allocation3], 128  }
  0x47   :  { %4122 = vsyncadd [#allocation3], 4294967168 }
  0x48   :  { %4123 = dma.done.wait [#allocation6], 33344  }
  0x49   :  { %4124 = vsyncadd [#allocation6], 4294933952 }
  0x4a   :  { %4125 = dma.done.wait [#allocation9], 4800  }
  0x4b   :  { %4126 = vsyncadd [#allocation9], 4294962496  ;;  %v4139_v0 = vmov 0   ;;  %v3602_v1 = vld [vmem:[#allocation5 + $0x4] ss:$28 sps:$4 sm:$0xff]   ;;  %v91_v3 = vld [vmem:[#allocation5 + $0x38] sm:$0xff] }
  0x4c   :  { %207 = vmatprep.mubr.bf16.mxu0 %v4139_v0  ;;  %248 = vmatprep.mubr.bf16.mxu1 %v4139_v0  ;;  %v3604_v2 = vld [vmem:[#allocation5] ss:$28 sps:$4 sm:$0xff]   ;;  %vm153_vm0 = vcmask 1043456   ;;  %v3102_v5 = vcombine.high %v91_v3, %v91_v3  ;;  %v3101_v6 = vcombine.low %v91_v3, %v91_v3  ;;  %v3607_v7 = vld [vmem:[#allocation5 + $0xc] ss:$28 sps:$4 sm:$0xff]   ;;  %vm149_vm1 = vcmask 195584  }
  0x4d   :  { %v81_v4 = vld [vmem:[#allocation2] sm:$0xff]  ;;  %175 = vmatprep.subr.bf16.mxu0 %v3602_v1  ;;  %v3609_v8 = vld [vmem:[#allocation5 + $0x8] ss:$28 sps:$4 sm:$0xff]   ;;  %216 = vmatprep.subr.bf16.mxu1 %v3607_v7  ;;  %v3614_v13 = vld [vmem:[#allocation5 + $0x14] ss:$28 sps:$4 sm:$0xff]   ;;  %v4140_v21 = vmov 0.0  }
  0x4e   :  { %176 = vmatpush1.bf16.msra.mxu0 %v3604_v2  ;;  %v92_v9 = vld [vmem:[#allocation5 + $0x40] sm:$0xff]  ;;  %v155_v10 = vsel %vm153_vm0, %v3101_v6, 0  ;;  %217 = vmatpush1.bf16.msra.mxu1 %v3609_v8  ;;  %v93_v14 = vld [vmem:[#allocation5 + $0x48] sm:$0xff]  ;;  %v82_v15 = vpack.c.bf16 %v81_v4, %v81_v4  ;;  %v3617_v20 = vld [vmem:[#allocation5 + $0x18] ss:$28 sps:$4 sm:$0xff]   ;;  %vm4141_vm2 = vmmov 0  }
  0x4f   :  { %3108 = vmatprep.subr.msk.bf16.mxu0 %vm153_vm0, %v3102_v5  ;;  %v3104_v11 = vcombine.high %v92_v9, %v92_v9  ;;  %v3103_v12 = vcombine.low %v92_v9, %v92_v9  ;;  %v3612_v17 = vld [vmem:[#allocation5 + $0x10] ss:$28 sps:$4 sm:$0xff]   ;;  %v3106_v18 = vcombine.high %v93_v14, %v93_v14  ;;  %v3105_v19 = vcombine.low %v93_v14, %v93_v14  ;;  %v3624_v26 = vld [vmem:[#allocation7 + $0xc] ss:$20 sps:$4 sm:$0xff]   ;;  %v3630_v30 = vld [vmem:[#allocation7 + $0x34] ss:$20 sps:$4 sm:$0xff]  }
  0x50   :  { %v3618_v22 = vld [vmem:[#allocation5 + $0x50] ss:$0 sps:$4 sm:$0xff]   ;;  %v3621_v24 = vld [vmem:[#allocation7 + $0x4] ss:$20 sps:$4 sm:$0xff]   ;;  %v3619_v27 = vld [vmem:[#allocation7] ss:$20 sps:$4 sm:$0xff]  }
  0x51   :  { %3110 = vmatprep.subr.msk.bf16.mxu1 %vm153_vm0, %v3104_v11  ;;  %v161_v16 = vsel %vm153_vm0, %v3103_v12, 0  ;;  %v167_v23 = vsel %vm153_vm0, %v3105_v19, 0  ;;  %v173_v25 = vsel %vm153_vm0, %v3618_v22, 0  ;;  %v3627_v28 = vld [vmem:[#allocation7 + $0x2c] ss:$20 sps:$4 sm:$0xff]   ;;  %vm2058_vm3 = vcmask 261120  }
  0x52   :  { %178 = vmatpush1.bf16.msra.mxu0 %v155_v10  ;;  %219 = vmatpush1.bf16.msra.mxu1 %v161_v16  ;;  %v3622_v29 = vld [vmem:[#allocation7 + $0x8] ss:$20 sps:$4 sm:$0xff]   ;;  %v3628_v33 = vld [vmem:[#allocation7 + $0x30] ss:$20 sps:$4 sm:$0xff]   ;;  %v3634_v37 = vld [vmem:[#allocation7 + $0x58] ss:$20 sps:$4 sm:$0xff]  }
  0x53   :  { %257 = vmatprep.subr.bf16.mxu0 %v3614_v13  ;;  %3531 = vmatprep.subr.bf16.mxu1 %v4140_v21  ;;  %v3625_v31 = vld [vmem:[#allocation7 + $0x28] ss:$20 sps:$4 sm:$0xff]   ;;  %v3631_v35 = vld [vmem:[#allocation7 + $0x50] ss:$20 sps:$4 sm:$0xff]   ;;  %v3637_v39 = vld [vmem:[#allocation7 + $0x78] ss:$20 sps:$4 sm:$0xff]  }
  0x54   :  { %v3633_v32 = vld [vmem:[#allocation7 + $0x54] ss:$20 sps:$4 sm:$0xff]   ;;  %v3636_v34 = vld [vmem:[#allocation7 + $0x5c] ss:$20 sps:$4 sm:$0xff]   ;;  %v3642_v38 = vld [vmem:[#allocation7 + $0x84] ss:$20 sps:$4 sm:$0xff]  }
  0x55   :  { %3109 = vmatmul.mubr.msk.bf16.vlgmr.msra.gmra.mrb[0].mxu0 %vm149_vm1, %v82_v15  ;;  %3111 = vmatmul.mubr.msk.bf16.vlgmr.msra.gmra.mrb[0].mxu1 %vm149_vm1, %v82_v15  ;;  %v3639_v36 = vld [vmem:[#allocation7 + $0x7c] ss:$20 sps:$4 sm:$0xff]   ;;  %v3645_v40 = vld [vmem:[#allocation7 + $0xa4] ss:$20 sps:$4 sm:$0xff]   ;;  %v3640_v41 = vld [vmem:[#allocation7 + $0x80] ss:$20 sps:$4 sm:$0xff]  }
  0x56   :  { %258 = vmatpush1.bf16.msra.mxu0 %v3612_v17  ;;  %289 = vmatprep.mubr.bf16.mxu0 %v4139_v0  ;;  %v3648_v42 = vld [vmem:[#allocation7 + $0xac] ss:$20 sps:$4 sm:$0xff]   ;;  %v3646_v45 = vld [vmem:[#allocation7 + $0xa8] ss:$20 sps:$4 sm:$0xff]   ;;  %v3652_v49 = vld [vmem:[#allocation7 + $0xd0] ss:$20 sps:$4 sm:$0xff]  }
  0x57   :  { %3112 = vmatprep.subr.msk.bf16.mxu0 %vm153_vm0, %v3106_v18  ;;  %3532 = vmatpush3.bf16.msra.mxu1 %v3617_v20  ;;  %v3643_v43 = vld [vmem:[#allocation7 + $0xa0] ss:$20 sps:$4 sm:$0xff]   ;;  %v3649_v47 = vld [vmem:[#allocation7 + $0xc8] ss:$20 sps:$4 sm:$0xff]   ;;  %v3655_v51 = vld [vmem:[#allocation7 + $0xf0] ss:$20 sps:$4 sm:$0xff]  }
  0x58   :  { %3535 = vmatprep.mubr.msk.bf16.mxu1 %vm4141_vm2, %v4140_v21  ;;  %3533 = vmatprep.subr.bf16.mxu1 %v4140_v21  ;;  %v3651_v44 = vld [vmem:[#allocation7 + $0xcc] ss:$20 sps:$4 sm:$0xff]   ;;  %v3654_v46 = vld [vmem:[#allocation7 + $0xd4] ss:$20 sps:$4 sm:$0xff]   ;;  %v3660_v50 = vld [vmem:[#allocation7 + $0xfc] ss:$20 sps:$4 sm:$0xff]  }
  0x59   :  { %v3657_v48 = vld [vmem:[#allocation7 + $0xf4] ss:$20 sps:$4 sm:$0xff]   ;;  %v3663_v52 = vld [vmem:[#allocation7 + $0x11c] ss:$20 sps:$4 sm:$0xff]   ;;  %v3658_v53 = vld [vmem:[#allocation7 + $0xf8] ss:$20 sps:$4 sm:$0xff]  }
  0x5a   :  { %260 = vmatpush1.bf16.msra.mxu0 %v167_v23  ;;  %v3661_v54 = vld [vmem:[#allocation7 + $0x118] ss:$20 sps:$4 sm:$0xff]   ;;  %v3664_v56 = vld [vmem:[#allocation7 + $0x120] ss:$20 sps:$4 sm:$0xff]   ;;  %v3670_v61 = vld [vmem:[#allocation7 + $0x148] ss:$20 sps:$4 sm:$0xff]  }
  0x5b   :  { %2062 = vmatprep.subr.bf16.mxu0 %v3621_v24  ;;  %3534 = vmatpush3.bf16.msra.mxu1 %v173_v25  ;;  %v3666_v55 = vld [vmem:[#allocation7 + $0x124] ss:$20 sps:$4 sm:$0xff]   ;;  %v3672_v58 = vld [vmem:[#allocation7 + $0x14c] ss:$20 sps:$4 sm:$0xff]   ;;  %v3678_v62 = vld [vmem:[#allocation7 + $0x174] ss:$20 sps:$4 sm:$0xff]  }
  0x5c   :  { %2226 = vmatprep.subr.bf16.mxu1 %v3624_v26  ;;  %v3669_v57 = vld [vmem:[#allocation7 + $0x144] ss:$20 sps:$4 sm:$0xff]   ;;  %v3667_v59 = vld [vmem:[#allocation7 + $0x140] ss:$20 sps:$4 sm:$0xff]   ;;  %v3673_v63 = vld [vmem:[#allocation7 + $0x168] ss:$20 sps:$4 sm:$0xff]  }
  0x5d   :  { %3113 = vmatmul.mubr.msk.bf16.vlgmr.msra.gmra.mrb[4].mxu0 %vm149_vm1, %v82_v15  ;;  %v3675_v60 = vld [vmem:[#allocation7 + $0x16c] ss:$20 sps:$4 sm:$0xff]   ;;  %v3681_v1 = vld [vmem:[#allocation7 + $0x194] ss:$20 sps:$4 sm:$0xff]   ;;  %v3676_v2 = vld [vmem:[#allocation7 + $0x170] ss:$20 sps:$4 sm:$0xff]  }
  0x5e   :  { %2063 = vmatpush1.bf16.msra.mxu0 %v3619_v27  ;;  %3536 = vmatmul.mubr.msk.bf16.vlgmr.msra.gmra.mrb[4].mxu1 %vm149_vm1, %v82_v15  ;;  %v3684_v3 = vld [vmem:[#allocation7 + $0x19c] ss:$20 sps:$4 sm:$0xff]   ;;  %v3682_v6 = vld [vmem:[#allocation7 + $0x198] ss:$20 sps:$4 sm:$0xff]   ;;  %v3688_v10 = vld [vmem:[#allocation7 + $0x1c0] ss:$20 sps:$4 sm:$0xff]  }
  0x5f   :  { %2064 = vmatprep.subr.bf16.mxu0 %v3627_v28  ;;  %2227 = vmatpush1.bf16.msra.mxu1 %v3622_v29  ;;  %v3679_v4 = vld [vmem:[#allocation7 + $0x190] ss:$20 sps:$4 sm:$0xff]   ;;  %v3685_v8 = vld [vmem:[#allocation7 + $0x1b8] ss:$20 sps:$4 sm:$0xff]   ;;  %v3691_v12 = vld [vmem:[#allocation7 + $0x1e0] ss:$20 sps:$4 sm:$0xff]  }
  0x60   :  { %2228 = vmatprep.subr.bf16.mxu1 %v3630_v30  ;;  %v3687_v5 = vld [vmem:[#allocation7 + $0x1bc] ss:$20 sps:$4 sm:$0xff]   ;;  %v3690_v7 = vld [vmem:[#allocation7 + $0x1c4] ss:$20 sps:$4 sm:$0xff]   ;;  %v3696_v11 = vld [vmem:[#allocation7 + $0x1ec] ss:$20 sps:$4 sm:$0xff]  }
  0x61   :  { %v3693_v9 = vld [vmem:[#allocation7 + $0x1e4] ss:$20 sps:$4 sm:$0xff]   ;;  %v3699_v13 = vld [vmem:[#allocation7 + $0x20c] ss:$20 sps:$4 sm:$0xff]   ;;  %v3694_v14 = vld [vmem:[#allocation7 + $0x1e8] ss:$20 sps:$4 sm:$0xff]  }
  0x62   :  { %2065 = vmatpush1.bf16.msra.mxu0 %v3625_v31  ;;  %v3702_v15 = vld [vmem:[#allocation7 + $0x214] ss:$20 sps:$4 sm:$0xff]   ;;  %v3700_v17 = vld [vmem:[#allocation7 + $0x210] ss:$20 sps:$4 sm:$0xff]   ;;  %v3706_v22 = vld [vmem:[#allocation7 + $0x238] ss:$20 sps:$4 sm:$0xff]   ;;  %v351_v31 = vlaneseq }
  0x63   :  { %2066 = vmatprep.subr.bf16.mxu0 %v3633_v32  ;;  %2229 = vmatpush1.bf16.msra.mxu1 %v3628_v33  ;;  %v3697_v16 = vld [vmem:[#allocation7 + $0x208] ss:$20 sps:$4 sm:$0xff]   ;;  %v3703_v20 = vld [vmem:[#allocation7 + $0x230] ss:$20 sps:$4 sm:$0xff]   ;;  %v3709_v25 = vld [vmem:[#allocation7 + $0x258] ss:$20 sps:$4 sm:$0xff]  }
  0x64   :  { %2230 = vmatprep.subr.bf16.mxu1 %v3636_v34  ;;  %v3705_v18 = vld [vmem:[#allocation7 + $0x234] ss:$20 sps:$4 sm:$0xff]   ;;  %v3708_v19 = vld [vmem:[#allocation7 + $0x23c] ss:$20 sps:$4 sm:$0xff]   ;;  %v3714_v24 = vld [vmem:[#allocation7 + $0x264] ss:$20 sps:$4 sm:$0xff]  }
  0x65   :  { %v3711_v23 = vld [vmem:[#allocation7 + $0x25c] ss:$20 sps:$4 sm:$0xff]   ;;  %v3712_v26 = vld [vmem:[#allocation7 + $0x260] ss:$20 sps:$4 sm:$0xff]   ;;  %v3717_v27 = vld [vmem:[#allocation7 + $0x284] ss:$20 sps:$4 sm:$0xff]  }
  0x66   :  { %2067 = vmatpush1.bf16.msra.mxu0 %v3631_v35  ;;  %v3720_v28 = vld [vmem:[#allocation7 + $0x28c] ss:$20 sps:$4 sm:$0xff]   ;;  %v4142_v29 = vmov 1966171168   ;;  %v352_v33 = vshrl.u32 %v351_v31, 7  ;;  %vm2948_vm4 = vcmask 719872  }
  0x67   :  { %2068 = vmatprep.subr.bf16.mxu0 %v3639_v36  ;;  %2231 = vmatpush1.bf16.msra.mxu1 %v3634_v37  ;;  %v349_v30 = vunpack.c.l.s4 %v4142_v29  ;;  %v345_v35 = vld [vmem:[%s4395_s2] sm:$0x7f]  ;;  %s4143_s8 = smov [#allocation10]  }
  0x68   :  { %2232 = vmatprep.subr.bf16.mxu1 %v3642_v38  ;;  %v3727_v29 = vld [vmem:[#allocation7 + $0x2d0] ss:$20 sps:$4 sm:$0xff]   ;;  %s3083_s9 = sshll.u32 %s4143_s8, 4  ;;  %s3084_s9 = int_to_ptr.vmem [resolvable:$true] %s3083_s9 }
  0x69   :  { %v350_v32 = vunpack.c.0.s8 %v349_v30  ;;  %v3730_v30 = vld [vmem:[#allocation7 + $0x2d8] ss:$20 sps:$4 sm:$0xff]   ;;  %p4104_p5 = scmp.lt.s32.totalorder %s3084_s9, %s3084_s9 }
  0x6a   :  { %2069 = vmatpush1.bf16.msra.mxu0 %v3637_v39 }
  0x6b   :  { %2070 = vmatprep.subr.bf16.mxu0 %v3645_v40  ;;  %2233 = vmatpush1.bf16.msra.mxu1 %v3640_v41  ;;  %v4250_v34 = vsub.s32 %v350_v32, %v352_v33  ;;  %v347_v40 = vcombine.high %v345_v35, %v345_v35  ;;  %v3735_v32 = vld [vmem:[#allocation7 + $0x2fc] ss:$20 sps:$4 sm:$0xff]  }
  0x6c   :  { %2234 = vmatprep.subr.bf16.mxu1 %v3648_v42 }
  0x6d   :  { %v354_v36 = vrot.slane %v345_v35, %v4250_v34 }
  0x6e   :  { %2071 = vmatpush1.bf16.msra.mxu0 %v3643_v43  ;;  %v4262_v43 = vsub.s32 0, %v352_v33  ;;  %v3738_v33 = vld [vmem:[#allocation7 + $0x304] ss:$20 sps:$4 sm:$0xff]  }
  0x6f   :  { %2072 = vmatprep.subr.bf16.mxu0 %v3651_v44  ;;  %2235 = vmatpush1.bf16.msra.mxu1 %v3646_v45  ;;  %v362_v37 = vcombine.high %v354_v36, %v354_v36  ;;  %v4257_v38 = vrot.slane %v354_v36, %v4250_v34  ;;  %v4265_v45 = vrot.slane %v347_v40, %v4250_v34  ;;  %v3733_v36 = vld [vmem:[#allocation7 + $0x2f8] ss:$20 sps:$4 sm:$0xff]  }
  0x70   :  { %2236 = vmatprep.subr.bf16.mxu1 %v3654_v46  ;;  %v3744_v40 = vld [vmem:[#allocation7 + $0x32c] ss:$20 sps:$4 sm:$0xff]  }
  0x71   :  { %v384_v39 = vrot.slane %v362_v37, %v4250_v34  ;;  %v396_v42 = vpack.i.b16 %v4257_v38, %v4257_v38  ;;  %v3736_v37 = vld [vmem:[#allocation7 + $0x300] ss:$20 sps:$4 sm:$0xff]  }
  0x72   :  { %2073 = vmatpush1.bf16.msra.mxu0 %v3649_v47 }
  0x73   :  { %2074 = vmatprep.subr.bf16.mxu0 %v3657_v48  ;;  %2237 = vmatpush1.bf16.msra.mxu1 %v3652_v49  ;;  %v394_v41 = vcombine.high %v384_v39, %v384_v39  ;;  %v403_v44 = vpack.i.b16 %v384_v39, %v384_v39  ;;  %v401_v47 = vrot.slane %v396_v42, %v4262_v43  ;;  %v3741_v39 = vld [vmem:[#allocation7 + $0x324] ss:$20 sps:$4 sm:$0xff]   ;;  %v3742_v42 = vld [vmem:[#allocation7 + $0x328] ss:$20 sps:$4 sm:$0xff]  }
  0x74   :  { %2238 = vmatprep.subr.bf16.mxu1 %v3660_v50  ;;  %v377_v48 = vrot.slane %v4265_v45, %v4250_v34 }
  0x75   :  { %v417_v46 = vpack.i.b16 %v394_v41, %v394_v41  ;;  %v408_v50 = vrot.slane %v403_v44, %v4262_v43  ;;  %v3739_v41 = vld [vmem:[#allocation7 + $0x320] ss:$20 sps:$4 sm:$0xff]  }
  0x76   :  { %2075 = vmatpush1.bf16.msra.mxu0 %v3655_v51  ;;  %v3747_v44 = vld [vmem:[#allocation7 + $0x34c] ss:$20 sps:$4 sm:$0xff]  }
  0x77   :  { %2076 = vmatprep.subr.bf16.mxu0 %v3663_v52  ;;  %2239 = vmatpush1.bf16.msra.mxu1 %v3658_v53 }
  0x78   :  { %2240 = vmatprep.subr.bf16.mxu1 %v3666_v55 }
  0x7a   :  { %2077 = vmatpush1.bf16.msra.mxu0 %v3661_v54 }
  0x7b   :  { %2078 = vmatprep.subr.bf16.mxu0 %v3669_v57  ;;  %2241 = vmatpush1.bf16.msra.mxu1 %v3664_v56  ;;  %v422_v56 = vrot.slane %v417_v46, %v4262_v43  ;;  %v3750_v46 = vld [vmem:[#allocation7 + $0x354] ss:$20 sps:$4 sm:$0xff]  }
  0x7c   :  { %2242 = vmatprep.subr.bf16.mxu1 %v3672_v58 }
  0x7e   :  { %2079 = vmatpush1.bf16.msra.mxu0 %v3667_v59 }
  0x7f   :  { %2080 = vmatprep.subr.bf16.mxu0 %v3675_v60  ;;  %2243 = vmatpush1.bf16.msra.mxu1 %v3670_v61  ;;  %v424_v60 = vpack.i.b16 %v377_v48, %v377_v48 }
  0x80   :  { %2244 = vmatprep.subr.bf16.mxu1 %v3678_v62 }
  0x82   :  { %2081 = vmatpush1.bf16.msra.mxu0 %v3673_v63 }
  0x83   :  { %2082 = vmatprep.subr.bf16.mxu0 %v3681_v1  ;;  %2245 = vmatpush1.bf16.msra.mxu1 %v3676_v2 }
  0x84   :  { %2246 = vmatprep.subr.bf16.mxu1 %v3684_v3  ;;  %v3715_v3 = vld [vmem:[#allocation7 + $0x280] ss:$20 sps:$4 sm:$0xff]  }
  0x86   :  { %2083 = vmatpush1.bf16.msra.mxu0 %v3679_v4  ;;  %v3718_v4 = vld [vmem:[#allocation7 + $0x288] ss:$20 sps:$4 sm:$0xff]  }
  0x87   :  { %2084 = vmatprep.subr.bf16.mxu0 %v3687_v5  ;;  %2247 = vmatpush1.bf16.msra.mxu1 %v3682_v6 }
  0x88   :  { %2248 = vmatprep.subr.bf16.mxu1 %v3690_v7  ;;  %v3723_v7 = vld [vmem:[#allocation7 + $0x2ac] ss:$20 sps:$4 sm:$0xff]  }
  0x8a   :  { %2085 = vmatpush1.bf16.msra.mxu0 %v3685_v8  ;;  %v3726_v8 = vld [vmem:[#allocation7 + $0x2b4] ss:$20 sps:$4 sm:$0xff]  }
  0x8b   :  { %2086 = vmatprep.subr.bf16.mxu0 %v3693_v9  ;;  %2249 = vmatpush1.bf16.msra.mxu1 %v3688_v10  ;;  %v429_v9 = vrot.slane %v424_v60, %v4262_v43  ;;  %v3763_v60 = vld [vmem:[#allocation7 + $0x3c0] ss:$20 sps:$4 sm:$0xff]  }
  0x8c   :  { %2250 = vmatprep.subr.bf16.mxu1 %v3696_v11 }
  0x8e   :  { %2087 = vmatpush1.bf16.msra.mxu0 %v3691_v12 }
  0x8f   :  { %2088 = vmatprep.subr.bf16.mxu0 %v3699_v13  ;;  %2251 = vmatpush1.bf16.msra.mxu1 %v3694_v14  ;;  %v3721_v14 = vld [vmem:[#allocation7 + $0x2a8] ss:$20 sps:$4 sm:$0xff]  }
  0x90   :  { %2252 = vmatprep.subr.bf16.mxu1 %v3702_v15  ;;  %v3724_v15 = vld [vmem:[#allocation7 + $0x2b0] ss:$20 sps:$4 sm:$0xff]  }
  0x92   :  { %2089 = vmatpush1.bf16.msra.mxu0 %v3697_v16 }
  0x93   :  { %2253 = vmatpush1.bf16.msra.mxu1 %v3700_v17  ;;  %2090 = vmatprep.subr.bf16.mxu0 %v3705_v18  ;;  %v393_v18 = vcombine.high %v377_v48, %v377_v48  ;;  %v3748_v48 = vld [vmem:[#allocation7 + $0x350] ss:$20 sps:$4 sm:$0xff]  }
  0x94   :  { %2254 = vmatprep.subr.bf16.mxu1 %v3708_v19  ;;  %v3729_v19 = vld [vmem:[#allocation7 + $0x2d4] ss:$20 sps:$4 sm:$0xff]  }
  0x96   :  { %2091 = vmatpush1.bf16.msra.mxu0 %v3703_v20  ;;  %v3732_v20 = vld [vmem:[#allocation7 + $0x2dc] ss:$20 sps:$4 sm:$0xff]  }
  0x97   :  { %2255 = vmatpush1.bf16.msra.mxu1 %v3706_v22  ;;  %2092 = vmatprep.subr.bf16.mxu0 %v3711_v23 }
  0x98   :  { %2256 = vmatprep.subr.bf16.mxu1 %v3714_v24 }
  0x9a   :  { %2093 = vmatpush1.bf16.msra.mxu0 %v3709_v25 }
  0x9b   :  { %2257 = vmatpush1.bf16.msra.mxu1 %v3712_v26  ;;  %2103 = vmatprep.subr.bf16.mxu0 %v3717_v27  ;;  %v438_v26 = vpack.i.b16 %v393_v18, %v393_v18  ;;  %v392_v18 = vcombine.high %v4257_v38, %v4257_v38 }
  0x9c   :  { %2267 = vmatprep.subr.bf16.mxu1 %v3720_v28 }
  0x9d   :  { %v443_v31 = vrot.slane %v438_v26, %v4262_v43  ;;  %v410_v26 = vpack.i.b16 %v392_v18, %v392_v18  ;;  %v3858_v18 = vld [vmem:[#allocation7 + $0x624] ss:$20 sps:$4 sm:$0xff]  }
 0x128   :  { %v209_v49 = vpop.f32.mrb[0].mxu0  ;;  %v4271_v55 = vpop.f32.mrb[0].mxu1 }
 0x129   :  { %v338_v51 = vpack.c.bf16 %v209_v49, %v209_v49  ;;  %v211_v52 = vpop.f32.mrb[1].mxu0  ;;  %v252_v59 = vpop.f32.mrb[1].mxu1  ;;  %v3753_v49 = vld [vmem:[#allocation7 + $0x374] ss:$20 sps:$4 sm:$0xff]  }
 0x12a   :  { %v339_v53 = vpack.c.bf16 %v211_v52, %v211_v52  ;;  %v213_v54 = vpop.f32.mrb[2].mxu0  ;;  %v341_v62 = vpack.c.bf16 %v252_v59, %v252_v59  ;;  %v254_v63 = vpop.f32.mrb[2].mxu1  ;;  %v3754_v52 = vld [vmem:[#allocation7 + $0x378] ss:$20 sps:$4 sm:$0xff]  }
 0x12b   :  { %v444_v57 = vadd.bf16 %v401_v47, %v338_v51  ;;  %v214_v58 = vpop.f32.mrb[3].mxu0  ;;  %v255_v1 = vpop.f32.mrb[3].mxu1  ;;  %v3745_v47 = vld [vmem:[#allocation7 + $0x348] ss:$20 sps:$4 sm:$0xff]   ;;  %v3751_v51 = vld [vmem:[#allocation7 + $0x370] ss:$20 sps:$4 sm:$0xff]  }
 0x12c   :  { %v445_v61 = vadd.bf16 %v408_v50, %v339_v53  ;;  %v447_v5 = vadd.bf16 %v422_v56, %v341_v62  ;;  %v3756_v50 = vld [vmem:[#allocation7 + $0x37c] ss:$20 sps:$4 sm:$0xff]   ;;  %v3762_v54 = vld [vmem:[#allocation7 + $0x3a4] ss:$20 sps:$4 sm:$0xff]   ;;  %v3768_v59 = vld [vmem:[#allocation7 + $0x3cc] ss:$20 sps:$4 sm:$0xff]  }
 0x12d   :  { %v4278_v6 = vmax.bf16 %v4139_v0, %v444_v57  ;;  %v3759_v53 = vld [vmem:[#allocation7 + $0x39c] ss:$20 sps:$4 sm:$0xff]   ;;  %v3757_v56 = vld [vmem:[#allocation7 + $0x398] ss:$20 sps:$4 sm:$0xff]   ;;  %v3760_v57 = vld [vmem:[#allocation7 + $0x3a0] ss:$20 sps:$4 sm:$0xff]  }
 0x12e   :  { %v4275_v2 = vmax.bf16 %v4139_v0, %v445_v61  ;;  %v4284_v10 = vmax.bf16 %v4139_v0, %v447_v5  ;;  %v3765_v58 = vld [vmem:[#allocation7 + $0x3c4] ss:$20 sps:$4 sm:$0xff]   ;;  %v3766_v61 = vld [vmem:[#allocation7 + $0x3c8] ss:$20 sps:$4 sm:$0xff]   ;;  %v3771_v62 = vld [vmem:[#allocation7 + $0x3ec] ss:$20 sps:$4 sm:$0xff]  }
 0x12f   :  { %v3774_v63 = vld [vmem:[#allocation7 + $0x3f4] ss:$20 sps:$4 sm:$0xff]   ;;  %v3780_v5 = vld [vmem:[#allocation7 + $0x41c] ss:$20 sps:$4 sm:$0xff]  }
 0x130   :  { %2094 = vmatprep.mubr.bf16.mxu0 %v4275_v2  ;;  %2258 = vmatprep.mubr.bf16.mxu1 %v4275_v2  ;;  %v291_v11 = vpop.f32.mrb[4].mxu0  ;;  %v3769_v1 = vld [vmem:[#allocation7 + $0x3e8] ss:$20 sps:$4 sm:$0xff]  }
 0x131   :  { %2095 = vmatmul.mubr.bf16.vlgmr.msra.gmra.mrb[8].mxu0 %v4278_v6  ;;  %2259 = vmatmul.mubr.bf16.vlgmr.msra.gmra.mrb[8].mxu1 %v4278_v6  ;;  %v342_v12 = vpack.c.bf16 %v291_v11, %v291_v11  ;;  %v4288_v13 = vpop.f32.mrb[5].mxu0  ;;  %v332_v17 = vpop.f32.mrb[4].mxu1  ;;  %v3786_v11 = vld [vmem:[#allocation7 + $0x444] ss:$20 sps:$4 sm:$0xff]  }
 0x132   :  { %2104 = vmatpush1.bf16.msra.mxu0 %v3715_v3  ;;  %2268 = vmatpush1.bf16.msra.mxu1 %v3718_v4  ;;  %v295_v16 = vpop.f32.mrb[6].mxu0  ;;  %v3537_v24 = vpop.f32.mrb[5].mxu1  ;;  %v344_v25 = vpack.c.bf16 %v332_v17, %v332_v17  ;;  %v3772_v3 = vld [vmem:[#allocation7 + $0x3f0] ss:$20 sps:$4 sm:$0xff]   ;;  %v3777_v4 = vld [vmem:[#allocation7 + $0x414] ss:$20 sps:$4 sm:$0xff]   ;;  %v363_v17 = vcombine.high %v4265_v45, %v4265_v45 }
 0x133   :  { %2105 = vmatprep.subr.bf16.mxu0 %v3723_v7  ;;  %2269 = vmatprep.subr.bf16.mxu1 %v3726_v8  ;;  %v4290_v22 = vadd.bf16 %v429_v9, %v342_v12  ;;  %v296_v23 = vpop.f32.mrb[7].mxu0  ;;  %v335_v27 = vpop.f32.mrb[6].mxu1  ;;  %v3775_v7 = vld [vmem:[#allocation7 + $0x410] ss:$20 sps:$4 sm:$0xff]   ;;  %v3778_v8 = vld [vmem:[#allocation7 + $0x418] ss:$20 sps:$4 sm:$0xff]  }
 0x134   :  { %2135 = vmatprep.mubr.bf16.mxu0 %v4284_v10  ;;  %2299 = vmatprep.mubr.bf16.mxu1 %v4284_v10  ;;  %v3538_v28 = vpop.f32.mrb[7].mxu1  ;;  %v4295_v35 = vadd.bf16 %v443_v31, %v344_v25  ;;  %v3783_v9 = vld [vmem:[#allocation7 + $0x43c] ss:$20 sps:$4 sm:$0xff]   ;;  %v3781_v12 = vld [vmem:[#allocation7 + $0x438] ss:$20 sps:$4 sm:$0xff]   ;;  %v391_v25 = vrot.slane %v363_v17, %v4250_v34  ;;  %v415_v31 = vrot.slane %v410_v26, %v4262_v43 }
 0x135   :  { %v3792_v16 = vld [vmem:[#allocation7 + $0x46c] ss:$20 sps:$4 sm:$0xff]   ;;  %v3798_v24 = vld [vmem:[#allocation7 + $0x494] ss:$20 sps:$4 sm:$0xff]   ;;  %v3796_v28 = vld [vmem:[#allocation7 + $0x490] ss:$20 sps:$4 sm:$0xff]  }
 0x136   :  { %2106 = vmatpush1.bf16.msra.mxu0 %v3721_v14  ;;  %2270 = vmatpush1.bf16.msra.mxu1 %v3724_v15  ;;  %v3784_v14 = vld [vmem:[#allocation7 + $0x440] ss:$20 sps:$4 sm:$0xff]   ;;  %v3789_v15 = vld [vmem:[#allocation7 + $0x464] ss:$20 sps:$4 sm:$0xff]   ;;  %v3793_v27 = vld [vmem:[#allocation7 + $0x488] ss:$20 sps:$4 sm:$0xff]   ;;  %v431_v38 = vpack.i.b16 %v391_v25, %v391_v25 }
 0x137   :  { %2107 = vmatprep.subr.bf16.mxu0 %v3729_v19  ;;  %2271 = vmatprep.subr.bf16.mxu1 %v3732_v20  ;;  %v3787_v19 = vld [vmem:[#allocation7 + $0x460] ss:$20 sps:$4 sm:$0xff]   ;;  %v3790_v20 = vld [vmem:[#allocation7 + $0x468] ss:$20 sps:$4 sm:$0xff]  }
 0x138   :  { %v3795_v23 = vld [vmem:[#allocation7 + $0x48c] ss:$20 sps:$4 sm:$0xff]   ;;  %v3801_v45 = vld [vmem:[#allocation7 + $0x4b4] ss:$20 sps:$4 sm:$0xff]   ;;  %v3855_v17 = vld [vmem:[#allocation7 + $0x61c] ss:$20 sps:$4 sm:$0xff]  }
 0x139   :  { %v3859_v25 = vld [vmem:[#allocation7 + $0x640] ss:$20 sps:$4 sm:$0xff]   ;;  %v3862_v26 = vld [vmem:[#allocation7 + $0x648] ss:$20 sps:$4 sm:$0xff]  }
 0x13a   :  { %2108 = vmatpush1.bf16.msra.mxu0 %v3727_v29  ;;  %2272 = vmatpush1.bf16.msra.mxu1 %v3730_v30  ;;  %v3804_v29 = vld [vmem:[#allocation7 + $0x4bc] ss:$20 sps:$4 sm:$0xff]   ;;  %v340_v30 = vpack.c.bf16 %v4271_v55, %v4271_v55  ;;  %v3808_v55 = vld [vmem:[#allocation7 + $0x4e0] ss:$20 sps:$4 sm:$0xff]  }
 0x13b   :  { %2109 = vmatprep.subr.bf16.mxu0 %v3735_v32  ;;  %2273 = vmatprep.subr.bf16.mxu1 %v3738_v33  ;;  %v3799_v32 = vld [vmem:[#allocation7 + $0x4b0] ss:$20 sps:$4 sm:$0xff]   ;;  %v3802_v33 = vld [vmem:[#allocation7 + $0x4b8] ss:$20 sps:$4 sm:$0xff]  }
 0x13e   :  { %2110 = vmatpush1.bf16.msra.mxu0 %v3733_v36  ;;  %2274 = vmatpush1.bf16.msra.mxu1 %v3736_v37  ;;  %v3807_v36 = vld [vmem:[#allocation7 + $0x4dc] ss:$20 sps:$4 sm:$0xff]   ;;  %v3810_v37 = vld [vmem:[#allocation7 + $0x4e4] ss:$20 sps:$4 sm:$0xff]  }
 0x13f   :  { %2111 = vmatprep.subr.bf16.mxu0 %v3741_v39  ;;  %2275 = vmatprep.subr.bf16.mxu1 %v3744_v40  ;;  %v343_v39 = vpack.c.bf16 %v4288_v13, %v4288_v13  ;;  %v436_v40 = vrot.slane %v431_v38, %v4262_v43  ;;  %v3819_v13 = vld [vmem:[#allocation7 + $0x52c] ss:$20 sps:$4 sm:$0xff]   ;;  %v3873_v38 = vld [vmem:[#allocation7 + $0x694] ss:$20 sps:$4 sm:$0xff]  }
 0x142   :  { %2112 = vmatpush1.bf16.msra.mxu0 %v3739_v41  ;;  %2276 = vmatpush1.bf16.msra.mxu1 %v3742_v42  ;;  %v446_v41 = vadd.bf16 %v415_v31, %v340_v30  ;;  %v3805_v42 = vld [vmem:[#allocation7 + $0x4d8] ss:$20 sps:$4 sm:$0xff]   ;;  %v3876_v30 = vld [vmem:[#allocation7 + $0x69c] ss:$20 sps:$4 sm:$0xff]  }
 0x143   :  { %2113 = vmatprep.subr.bf16.mxu0 %v3747_v44  ;;  %2277 = vmatprep.subr.bf16.mxu1 %v3750_v46  ;;  %v3813_v44 = vld [vmem:[#allocation7 + $0x504] ss:$20 sps:$4 sm:$0xff]   ;;  %v3816_v46 = vld [vmem:[#allocation7 + $0x50c] ss:$20 sps:$4 sm:$0xff]  }
 0x144   :  { %v3871_v31 = vld [vmem:[#allocation7 + $0x690] ss:$20 sps:$4 sm:$0xff]  }
 0x146   :  { %2114 = vmatpush1.bf16.msra.mxu0 %v3745_v47  ;;  %2278 = vmatpush1.bf16.msra.mxu1 %v3748_v48  ;;  %v449_v47 = vadd.bf16 %v436_v40, %v343_v39  ;;  %v4309_v48 = vmax.bf16 %v4139_v0, %v446_v41  ;;  %v3880_v39 = vld [vmem:[#allocation7 + $0x6c0] ss:$20 sps:$4 sm:$0xff]   ;;  %v3885_v40 = vld [vmem:[#allocation7 + $0x6e4] ss:$20 sps:$4 sm:$0xff]  }
 0x147   :  { %2115 = vmatprep.subr.bf16.mxu0 %v3753_v49  ;;  %2279 = vmatprep.subr.bf16.mxu1 %v3756_v50  ;;  %v3811_v49 = vld [vmem:[#allocation7 + $0x500] ss:$20 sps:$4 sm:$0xff]   ;;  %v3814_v50 = vld [vmem:[#allocation7 + $0x508] ss:$20 sps:$4 sm:$0xff]  }
 0x148   :  { %v3888_v41 = vld [vmem:[#allocation7 + $0x6ec] ss:$20 sps:$4 sm:$0xff]  }
 0x14a   :  { %2116 = vmatpush1.bf16.msra.mxu0 %v3751_v51  ;;  %2280 = vmatpush1.bf16.msra.mxu1 %v3754_v52  ;;  %v3822_v51 = vld [vmem:[#allocation7 + $0x534] ss:$20 sps:$4 sm:$0xff]   ;;  %v4312_v52 = vmax.bf16 %v4139_v0, %v449_v47 }
 0x14b   :  { %2117 = vmatprep.subr.bf16.mxu0 %v3759_v53  ;;  %2281 = vmatprep.subr.bf16.mxu1 %v3762_v54  ;;  %v3817_v53 = vld [vmem:[#allocation7 + $0x528] ss:$20 sps:$4 sm:$0xff]   ;;  %v3820_v54 = vld [vmem:[#allocation7 + $0x530] ss:$20 sps:$4 sm:$0xff]  }
 0x14c   :  { %v3889_v47 = vld [vmem:[#allocation7 + $0x708] ss:$20 sps:$4 sm:$0xff]  }
 0x14e   :  { %2118 = vmatpush1.bf16.msra.mxu0 %v3757_v56  ;;  %2282 = vmatpush1.bf16.msra.mxu1 %v3760_v57  ;;  %v3825_v56 = vld [vmem:[#allocation7 + $0x554] ss:$20 sps:$4 sm:$0xff]   ;;  %v3828_v57 = vld [vmem:[#allocation7 + $0x55c] ss:$20 sps:$4 sm:$0xff]  }
 0x14f   :  { %2119 = vmatprep.subr.bf16.mxu0 %v3765_v58  ;;  %2283 = vmatprep.subr.bf16.mxu1 %v3768_v59  ;;  %v3823_v58 = vld [vmem:[#allocation7 + $0x550] ss:$20 sps:$4 sm:$0xff]   ;;  %v3826_v59 = vld [vmem:[#allocation7 + $0x558] ss:$20 sps:$4 sm:$0xff]  }
 0x152   :  { %2120 = vmatpush1.bf16.msra.mxu0 %v3763_v60  ;;  %2284 = vmatpush1.bf16.msra.mxu1 %v3766_v61  ;;  %v3831_v60 = vld [vmem:[#allocation7 + $0x57c] ss:$20 sps:$4 sm:$0xff]   ;;  %v3834_v61 = vld [vmem:[#allocation7 + $0x584] ss:$20 sps:$4 sm:$0xff]  }
 0x153   :  { %2121 = vmatprep.subr.bf16.mxu0 %v3771_v62  ;;  %2285 = vmatprep.subr.bf16.mxu1 %v3774_v63  ;;  %v3829_v62 = vld [vmem:[#allocation7 + $0x578] ss:$20 sps:$4 sm:$0xff]   ;;  %v3832_v63 = vld [vmem:[#allocation7 + $0x580] ss:$20 sps:$4 sm:$0xff]  }
 0x156   :  { %2122 = vmatpush1.bf16.msra.mxu0 %v3769_v1  ;;  %2286 = vmatpush1.bf16.msra.mxu1 %v3772_v3  ;;  %v3837_v1 = vld [vmem:[#allocation7 + $0x5a4] ss:$20 sps:$4 sm:$0xff]   ;;  %v3840_v3 = vld [vmem:[#allocation7 + $0x5ac] ss:$20 sps:$4 sm:$0xff]  }
 0x157   :  { %2123 = vmatprep.subr.bf16.mxu0 %v3777_v4  ;;  %2287 = vmatprep.subr.bf16.mxu1 %v3780_v5  ;;  %v3835_v4 = vld [vmem:[#allocation7 + $0x5a0] ss:$20 sps:$4 sm:$0xff]   ;;  %v3838_v5 = vld [vmem:[#allocation7 + $0x5a8] ss:$20 sps:$4 sm:$0xff]  }
 0x15a   :  { %2124 = vmatpush1.bf16.msra.mxu0 %v3775_v7  ;;  %2288 = vmatpush1.bf16.msra.mxu1 %v3778_v8  ;;  %v3843_v7 = vld [vmem:[#allocation7 + $0x5cc] ss:$20 sps:$4 sm:$0xff]   ;;  %v3846_v8 = vld [vmem:[#allocation7 + $0x5d4] ss:$20 sps:$4 sm:$0xff]  }
 0x15b   :  { %2125 = vmatprep.subr.bf16.mxu0 %v3783_v9  ;;  %2289 = vmatprep.subr.bf16.mxu1 %v3786_v11  ;;  %v3841_v9 = vld [vmem:[#allocation7 + $0x5c8] ss:$20 sps:$4 sm:$0xff]   ;;  %v3844_v11 = vld [vmem:[#allocation7 + $0x5d0] ss:$20 sps:$4 sm:$0xff]  }
 0x15e   :  { %2126 = vmatpush1.bf16.msra.mxu0 %v3781_v12  ;;  %2290 = vmatpush1.bf16.msra.mxu1 %v3784_v14  ;;  %v3849_v12 = vld [vmem:[#allocation7 + $0x5f4] ss:$20 sps:$4 sm:$0xff]   ;;  %v3852_v14 = vld [vmem:[#allocation7 + $0x5fc] ss:$20 sps:$4 sm:$0xff]  }
 0x15f   :  { %2127 = vmatprep.subr.bf16.mxu0 %v3789_v15  ;;  %2291 = vmatprep.subr.bf16.mxu1 %v3792_v16  ;;  %v3847_v15 = vld [vmem:[#allocation7 + $0x5f0] ss:$20 sps:$4 sm:$0xff]   ;;  %v3850_v16 = vld [vmem:[#allocation7 + $0x5f8] ss:$20 sps:$4 sm:$0xff]  }
 0x162   :  { %2128 = vmatpush1.bf16.msra.mxu0 %v3787_v19  ;;  %2292 = vmatpush1.bf16.msra.mxu1 %v3790_v20  ;;  %v3853_v19 = vld [vmem:[#allocation7 + $0x618] ss:$20 sps:$4 sm:$0xff]   ;;  %v3856_v20 = vld [vmem:[#allocation7 + $0x620] ss:$20 sps:$4 sm:$0xff]  }
 0x163   :  { %2129 = vmatprep.subr.bf16.mxu0 %v3795_v23  ;;  %2293 = vmatprep.subr.bf16.mxu1 %v3798_v24  ;;  %v3861_v23 = vld [vmem:[#allocation7 + $0x644] ss:$20 sps:$4 sm:$0xff]   ;;  %v3864_v24 = vld [vmem:[#allocation7 + $0x64c] ss:$20 sps:$4 sm:$0xff]  }
 0x166   :  { %2130 = vmatpush1.bf16.msra.mxu0 %v3793_v27  ;;  %2294 = vmatpush1.bf16.msra.mxu1 %v3796_v28  ;;  %v3867_v27 = vld [vmem:[#allocation7 + $0x66c] ss:$20 sps:$4 sm:$0xff]   ;;  %v3870_v28 = vld [vmem:[#allocation7 + $0x674] ss:$20 sps:$4 sm:$0xff]  }
 0x167   :  { %2131 = vmatprep.subr.bf16.mxu0 %v3801_v45  ;;  %2295 = vmatprep.subr.bf16.mxu1 %v3804_v29  ;;  %v3865_v45 = vld [vmem:[#allocation7 + $0x668] ss:$20 sps:$4 sm:$0xff]   ;;  %v3868_v29 = vld [vmem:[#allocation7 + $0x670] ss:$20 sps:$4 sm:$0xff]  }
 0x16a   :  { %2132 = vmatpush1.bf16.msra.mxu0 %v3799_v32  ;;  %2296 = vmatpush1.bf16.msra.mxu1 %v3802_v33  ;;  %v3874_v32 = vld [vmem:[#allocation7 + $0x698] ss:$20 sps:$4 sm:$0xff]   ;;  %v3879_v33 = vld [vmem:[#allocation7 + $0x6bc] ss:$20 sps:$4 sm:$0xff]  }
 0x16b   :  { %2133 = vmatprep.subr.bf16.mxu0 %v3807_v36  ;;  %2297 = vmatprep.subr.bf16.mxu1 %v3810_v37  ;;  %v3882_v36 = vld [vmem:[#allocation7 + $0x6c4] ss:$20 sps:$4 sm:$0xff]  }
 0x16c   :  { %v3877_v37 = vld [vmem:[#allocation7 + $0x6b8] ss:$20 sps:$4 sm:$0xff]  }
 0x16e   :  { %2134 = vmatpush1.bf16.msra.mxu0 %v3805_v42  ;;  %2298 = vmatpush1.bf16.msra.mxu1 %v3808_v55  ;;  %v3883_v42 = vld [vmem:[#allocation7 + $0x6e0] ss:$20 sps:$4 sm:$0xff]   ;;  %v3886_v55 = vld [vmem:[#allocation7 + $0x6e8] ss:$20 sps:$4 sm:$0xff]  }
 0x16f   :  { %2144 = vmatprep.subr.bf16.mxu0 %v3813_v44  ;;  %2308 = vmatprep.subr.bf16.mxu1 %v3816_v46  ;;  %v3891_v44 = vld [vmem:[#allocation7 + $0x70c] ss:$20 sps:$4 sm:$0xff]   ;;  %v3894_v46 = vld [vmem:[#allocation7 + $0x714] ss:$20 sps:$4 sm:$0xff]  }
 0x171   :  { %2136 = vmatmul.mubr.bf16.vlgmr.msra.gmra.mrb[8].mxu0 %v4309_v48  ;;  %2300 = vmatmul.mubr.bf16.vlgmr.msra.gmra.mrb[8].mxu1 %v4309_v48 }
 0x172   :  { %2145 = vmatpush1.bf16.msra.mxu0 %v3811_v49  ;;  %2309 = vmatpush1.bf16.msra.mxu1 %v3814_v50  ;;  %v3892_v49 = vld [vmem:[#allocation7 + $0x710] ss:$20 sps:$4 sm:$0xff]   ;;  %v3898_v50 = vld [vmem:[#allocation7 + $0x734] ss:$20 sps:$4 sm:$0xff]  }
 0x173   :  { %2146 = vmatprep.subr.bf16.mxu0 %v3819_v13  ;;  %2310 = vmatprep.subr.bf16.mxu1 %v3822_v51  ;;  %v3901_v13 = vld [vmem:[#allocation7 + $0x73c] ss:$20 sps:$4 sm:$0xff]  }
 0x174   :  { %2176 = vmatprep.mubr.bf16.mxu0 %v4312_v52  ;;  %2340 = vmatprep.mubr.bf16.mxu1 %v4312_v52  ;;  %v3896_v51 = vld [vmem:[#allocation7 + $0x730] ss:$20 sps:$4 sm:$0xff]  }
 0x176   :  { %2147 = vmatpush1.bf16.msra.mxu0 %v3817_v53  ;;  %2311 = vmatpush1.bf16.msra.mxu1 %v3820_v54  ;;  %v3899_v53 = vld [vmem:[#allocation7 + $0x738] ss:$20 sps:$4 sm:$0xff]   ;;  %v3904_v54 = vld [vmem:[#allocation7 + $0x75c] ss:$20 sps:$4 sm:$0xff]  }
 0x177   :  { %2148 = vmatprep.subr.bf16.mxu0 %v3825_v56  ;;  %2312 = vmatprep.subr.bf16.mxu1 %v3828_v57  ;;  %v3907_v56 = vld [vmem:[#allocation7 + $0x764] ss:$20 sps:$4 sm:$0xff]  }
 0x178   :  { %v3902_v57 = vld [vmem:[#allocation7 + $0x758] ss:$20 sps:$4 sm:$0xff]  }
 0x17a   :  { %2149 = vmatpush1.bf16.msra.mxu0 %v3823_v58  ;;  %2313 = vmatpush1.bf16.msra.mxu1 %v3826_v59  ;;  %v3905_v58 = vld [vmem:[#allocation7 + $0x760] ss:$20 sps:$4 sm:$0xff]   ;;  %v3910_v59 = vld [vmem:[#allocation7 + $0x784] ss:$20 sps:$4 sm:$0xff]  }
 0x17b   :  { %2150 = vmatprep.subr.bf16.mxu0 %v3831_v60  ;;  %2314 = vmatprep.subr.bf16.mxu1 %v3834_v61  ;;  %v3913_v60 = vld [vmem:[#allocation7 + $0x78c] ss:$20 sps:$4 sm:$0xff]  }
 0x17c   :  { %v3908_v61 = vld [vmem:[#allocation7 + $0x780] ss:$20 sps:$4 sm:$0xff]  }
 0x17e   :  { %2151 = vmatpush1.bf16.msra.mxu0 %v3829_v62  ;;  %2315 = vmatpush1.bf16.msra.mxu1 %v3832_v63  ;;  %v3911_v62 = vld [vmem:[#allocation7 + $0x788] ss:$20 sps:$4 sm:$0xff]   ;;  %v4320_v63 = vmax.bf16 %v4139_v0, %v4290_v22  ;;  %v4328_v22 = vmax.bf16 %v4139_v0, %v4295_v35  ;;  %v3928_v35 = vld [vmem:[#allocation7 + $0x1a0] ss:$20 sps:$4 sm:$0xff]  }
 0x17f   :  { %2152 = vmatprep.subr.bf16.mxu0 %v3837_v1  ;;  %2316 = vmatprep.subr.bf16.mxu1 %v3840_v3  ;;  %v3916_v1 = vld [vmem:[#allocation7 + $0x7ac] ss:$20 sps:$4 sm:$0xff]   ;;  %v3919_v3 = vld [vmem:[#allocation7 + $0x7b4] ss:$20 sps:$4 sm:$0xff]  }
 0x182   :  { %2153 = vmatpush1.bf16.msra.mxu0 %v3835_v4  ;;  %2317 = vmatpush1.bf16.msra.mxu1 %v3838_v5  ;;  %v3914_v4 = vld [vmem:[#allocation7 + $0x7a8] ss:$20 sps:$4 sm:$0xff]   ;;  %v3917_v5 = vld [vmem:[#allocation7 + $0x7b0] ss:$20 sps:$4 sm:$0xff]  }
 0x183   :  { %2154 = vmatprep.subr.bf16.mxu0 %v3843_v7  ;;  %2318 = vmatprep.subr.bf16.mxu1 %v3846_v8  ;;  %v3920_v7 = vld [vmem:[#allocation7 + $0x150] ss:$20 sps:$4 sm:$0xff]  }
 0x184   :  { %v3921_v8 = vld [vmem:[#allocation7 + $0x3d0] ss:$20 sps:$4 sm:$0xff]  }
 0x186   :  { %2155 = vmatpush1.bf16.msra.mxu0 %v3841_v9  ;;  %2319 = vmatpush1.bf16.msra.mxu1 %v3844_v11  ;;  %v3922_v9 = vld [vmem:[#allocation7 + $0x10] ss:$20 sps:$4 sm:$0xff]  }
 0x187   :  { %2156 = vmatprep.subr.bf16.mxu0 %v3849_v12  ;;  %2320 = vmatprep.subr.bf16.mxu1 %v3852_v14  ;;  %v3923_v11 = vld [vmem:[#allocation7 + $0x290] ss:$20 sps:$4 sm:$0xff]   ;;  %v3924_v12 = vld [vmem:[#allocation7 + $0x178] ss:$20 sps:$4 sm:$0xff]  }
 0x188   :  { %v3925_v14 = vld [vmem:[#allocation7 + $0x3f8] ss:$20 sps:$4 sm:$0xff]  }
 0x18a   :  { %2157 = vmatpush1.bf16.msra.mxu0 %v3847_v15  ;;  %2321 = vmatpush1.bf16.msra.mxu1 %v3850_v16  ;;  %v3926_v15 = vld [vmem:[#allocation7 + $0x38] ss:$20 sps:$4 sm:$0xff]  }
 0x18b   :  { %2158 = vmatprep.subr.bf16.mxu0 %v3855_v17  ;;  %2322 = vmatprep.subr.bf16.mxu1 %v3858_v18  ;;  %v3927_v16 = vld [vmem:[#allocation7 + $0x2b8] ss:$20 sps:$4 sm:$0xff]   ;;  %v3929_v17 = vld [vmem:[#allocation7 + $0x420] ss:$20 sps:$4 sm:$0xff]  }
 0x18c   :  { %v3930_v18 = vld [vmem:[#allocation7 + $0x60] ss:$20 sps:$4 sm:$0xff]  }
 0x18e   :  { %2159 = vmatpush1.bf16.msra.mxu0 %v3853_v19  ;;  %2323 = vmatpush1.bf16.msra.mxu1 %v3856_v20  ;;  %v3931_v19 = vld [vmem:[#allocation7 + $0x2e0] ss:$20 sps:$4 sm:$0xff]   ;;  %v3932_v20 = vld [vmem:[#allocation7 + $0x1c8] ss:$20 sps:$4 sm:$0xff]  }
 0x18f   :  { %2160 = vmatprep.subr.bf16.mxu0 %v3861_v23  ;;  %2324 = vmatprep.subr.bf16.mxu1 %v3864_v24  ;;  %v3933_v23 = vld [vmem:[#allocation7 + $0x448] ss:$20 sps:$4 sm:$0xff]  }
 0x190   :  { %v3934_v24 = vld [vmem:[#allocation7 + $0x88] ss:$20 sps:$4 sm:$0xff]  }
 0x192   :  { %2161 = vmatpush1.bf16.msra.mxu0 %v3859_v25  ;;  %2325 = vmatpush1.bf16.msra.mxu1 %v3862_v26  ;;  %v3935_v25 = vld [vmem:[#allocation7 + $0x308] ss:$20 sps:$4 sm:$0xff]   ;;  %v3938_v26 = vld [vmem:[#allocation7 + $0xb0] ss:$20 sps:$4 sm:$0xff]  }
 0x193   :  { %2162 = vmatprep.subr.bf16.mxu0 %v3867_v27  ;;  %2326 = vmatprep.subr.bf16.mxu1 %v3870_v28  ;;  %v3939_v27 = vld [vmem:[#allocation7 + $0x330] ss:$20 sps:$4 sm:$0xff]   ;;  %v3940_v28 = vld [vmem:[#allocation7 + $0x218] ss:$20 sps:$4 sm:$0xff]  }
 0x196   :  { %2163 = vmatpush1.bf16.msra.mxu0 %v3865_v45  ;;  %2327 = vmatpush1.bf16.msra.mxu1 %v3868_v29  ;;  %v3941_v45 = vld [vmem:[#allocation7 + $0x498] ss:$20 sps:$4 sm:$0xff]  }
 0x197   :  { %2164 = vmatprep.subr.bf16.mxu0 %v3873_v38  ;;  %2328 = vmatprep.subr.bf16.mxu1 %v3876_v30  ;;  %v3942_v29 = vld [vmem:[#allocation7 + $0xd8] ss:$20 sps:$4 sm:$0xff]   ;;  %v3944_v30 = vld [vmem:[#allocation7 + $0x240] ss:$20 sps:$4 sm:$0xff]  }
 0x198   :  { %v3943_v38 = vld [vmem:[#allocation7 + $0x358] ss:$20 sps:$4 sm:$0xff]  }
 0x19a   :  { %2165 = vmatpush1.bf16.msra.mxu0 %v3871_v31  ;;  %2329 = vmatpush1.bf16.msra.mxu1 %v3874_v32  ;;  %v3945_v31 = vld [vmem:[#allocation7 + $0x4c0] ss:$20 sps:$4 sm:$0xff]  }
 0x19b   :  { %2166 = vmatprep.subr.bf16.mxu0 %v3879_v33  ;;  %2330 = vmatprep.subr.bf16.mxu1 %v3882_v36  ;;  %v3946_v32 = vld [vmem:[#allocation7 + $0x100] ss:$20 sps:$4 sm:$0xff]   ;;  %v3948_v36 = vld [vmem:[#allocation7 + $0x268] ss:$20 sps:$4 sm:$0xff]  }
 0x19c   :  { %v3947_v33 = vld [vmem:[#allocation7 + $0x380] ss:$20 sps:$4 sm:$0xff]  }
 0x19e   :  { %2167 = vmatpush1.bf16.msra.mxu0 %v3877_v37  ;;  %2331 = vmatpush1.bf16.msra.mxu1 %v3880_v39  ;;  %v3949_v37 = vld [vmem:[#allocation7 + $0x4e8] ss:$20 sps:$4 sm:$0xff]  }
 0x19f   :  { %2168 = vmatprep.subr.bf16.mxu0 %v3885_v40  ;;  %2332 = vmatprep.subr.bf16.mxu1 %v3888_v41  ;;  %v3950_v39 = vld [vmem:[#allocation7 + $0x128] ss:$20 sps:$4 sm:$0xff]   ;;  %v3952_v41 = vld [vmem:[#allocation7 + $0x650] ss:$20 sps:$4 sm:$0xff]  }
 0x1a0   :  { %v3951_v40 = vld [vmem:[#allocation7 + $0x3a8] ss:$20 sps:$4 sm:$0xff]  }
 0x1a2   :  { %2169 = vmatpush1.bf16.msra.mxu0 %v3883_v42  ;;  %2333 = vmatpush1.bf16.msra.mxu1 %v3886_v55  ;;  %v3953_v42 = vld [vmem:[#allocation7 + $0x510] ss:$20 sps:$4 sm:$0xff]  }
 0x1a3   :  { %2170 = vmatprep.subr.bf16.mxu0 %v3891_v44  ;;  %2334 = vmatprep.subr.bf16.mxu1 %v3894_v46  ;;  %v3954_v55 = vld [vmem:[#allocation7 + $0x790] ss:$20 sps:$4 sm:$0xff]   ;;  %v3955_v44 = vld [vmem:[#allocation7 + $0x678] ss:$20 sps:$4 sm:$0xff]  }
 0x1a4   :  { %v3956_v46 = vld [vmem:[#allocation7 + $0x538] ss:$20 sps:$4 sm:$0xff]  }
 0x1a6   :  { %2171 = vmatpush1.bf16.msra.mxu0 %v3889_v47  ;;  %2335 = vmatpush1.bf16.msra.mxu1 %v3892_v49  ;;  %v3957_v47 = vld [vmem:[#allocation7 + $0x7b8] ss:$20 sps:$4 sm:$0xff]   ;;  %v3958_v49 = vld [vmem:[#allocation7 + $0x6a0] ss:$20 sps:$4 sm:$0xff]  }
 0x1a7   :  { %2172 = vmatprep.subr.bf16.mxu0 %v3898_v50  ;;  %2336 = vmatprep.subr.bf16.mxu1 %v3901_v13  ;;  %v3970_v50 = vld [vmem:[#allocation8 + $0x40] sm:$0xff]  }
 0x1a8   :  { %v3959_v13 = vld [vmem:[#allocation7 + $0x560] ss:$20 sps:$4 sm:$0xff]  }
 0x1aa   :  { %2173 = vmatpush1.bf16.msra.mxu0 %v3896_v51  ;;  %2337 = vmatpush1.bf16.msra.mxu1 %v3899_v53  ;;  %v3974_v51 = vld [vmem:[#allocation8 + $0x48] sm:$0xff]   ;;  %v3962_v53 = vld [vmem:[#allocation7 + $0x6f0] ss:$20 sps:$4 sm:$0xff]  }
 0x1ab   :  { %2174 = vmatprep.subr.bf16.mxu0 %v3904_v54  ;;  %2338 = vmatprep.subr.bf16.mxu1 %v3907_v56  ;;  %v3976_v54 = vld [vmem:[#allocation8 + $0x8] sm:$0xff]   ;;  %v3978_v56 = vld [vmem:[#allocation8 + $0x50] sm:$0xff]  }
 0x1ae   :  { %2175 = vmatpush1.bf16.msra.mxu0 %v3902_v57  ;;  %2339 = vmatpush1.bf16.msra.mxu1 %v3905_v58  ;;  %v3963_v57 = vld [vmem:[#allocation7 + $0x5b0] ss:$20 sps:$4 sm:$0xff]   ;;  %v3964_v58 = vld [vmem:[#allocation7 + $0x718] ss:$20 sps:$4 sm:$0xff]  }
 0x1af   :  { %2185 = vmatprep.subr.bf16.mxu0 %v3910_v59  ;;  %2349 = vmatprep.subr.bf16.mxu1 %v3913_v60  ;;  %v3980_v59 = vld [vmem:[#allocation8 + $0x10] sm:$0xff]   ;;  %v3982_v60 = vld [vmem:[#allocation8 + $0x58] sm:$0xff]  }
 0x1b1   :  { %2177 = vmatmul.mubr.bf16.vlgmr.msra.gmra.mrb[8].mxu0 %v4320_v63  ;;  %2341 = vmatmul.mubr.bf16.vlgmr.msra.gmra.mrb[8].mxu1 %v4320_v63 }
 0x1b2   :  { %2186 = vmatpush1.bf16.msra.mxu0 %v3908_v61  ;;  %2350 = vmatpush1.bf16.msra.mxu1 %v3911_v62  ;;  %v3965_v61 = vld [vmem:[#allocation7 + $0x5d8] ss:$20 sps:$4 sm:$0xff]   ;;  %v3966_v62 = vld [vmem:[#allocation7 + $0x740] ss:$20 sps:$4 sm:$0xff]  }
 0x1b3   :  { %2187 = vmatprep.subr.bf16.mxu0 %v3916_v1  ;;  %2351 = vmatprep.subr.bf16.mxu1 %v3919_v3  ;;  %v3984_v1 = vld [vmem:[#allocation8 + $0x18] sm:$0xff]   ;;  %v3986_v3 = vld [vmem:[#allocation8 + $0x60] sm:$0xff]  }
 0x1b4   :  { %2217 = vmatprep.mubr.bf16.mxu0 %v4139_v0  ;;  %2381 = vmatprep.mubr.bf16.mxu1 %v4139_v0 }
 0x1b6   :  { %2188 = vmatpush1.bf16.msra.mxu0 %v3914_v4  ;;  %2352 = vmatpush1.bf16.msra.mxu1 %v3917_v5  ;;  %v3967_v4 = vld [vmem:[#allocation7 + $0x600] ss:$20 sps:$4 sm:$0xff]   ;;  %v3968_v5 = vld [vmem:[#allocation7 + $0x768] ss:$20 sps:$4 sm:$0xff]  }
 0x1b7   :  { %3411 = vmatprep.subr.bf16.mxu0 %v3920_v7  ;;  %3433 = vmatprep.subr.bf16.mxu1 %v3921_v8  ;;  %v3988_v7 = vld [vmem:[#allocation8 + $0x20] sm:$0xff]   ;;  %v3990_v8 = vld [vmem:[#allocation8 + $0x68] sm:$0xff]  }
 0x1bd   :  { %3365 = vmatmul.mubr.msk.bf16.vlgmr.msra.gmra.mrb[8].mxu0 %vm2058_vm3, %v4328_v22  ;;  %3366 = vmatmul.mubr.msk.bf16.vlgmr.msra.gmra.mrb[8].mxu1 %vm2058_vm3, %v4328_v22 }
 0x1be   :  { %3412 = vmatpush3.bf16.msra.mxu0 %v3922_v9  ;;  %3434 = vmatpush3.bf16.msra.mxu1 %v3923_v11  ;;  %v3971_v9 = vld [vmem:[#allocation8 + $0xc0] sm:$0xff]   ;;  %v3992_v11 = vld [vmem:[#allocation8 + $0x28] sm:$0xff]  }
 0x1bf   :  { %2422 = vmatprep.mubr.bf16.mxu0 %v4275_v2  ;;  %2462 = vmatprep.mubr.bf16.mxu1 %v4284_v10  ;;  %v3936_v2 = vld [vmem:[#allocation7 + $0x1f0] ss:$20 sps:$4 sm:$0xff]  }
 0x1c0   :  { %3413 = vmatprep.subr.bf16.mxu0 %v3924_v12  ;;  %3435 = vmatprep.subr.bf16.mxu1 %v3925_v14  ;;  %v3937_v10 = vld [vmem:[#allocation7 + $0x470] ss:$20 sps:$4 sm:$0xff]   ;;  %v3975_v14 = vld [vmem:[#allocation8 + $0xc8] sm:$0xff]  }
 0x1c1   :  { %v3973_v12 = vld [vmem:[#allocation8 + $0x80] sm:$0xff]  }
 0x1c2   :  { %3414 = vmatpush3.bf16.msra.mxu0 %v3926_v15  ;;  %3436 = vmatpush3.bf16.msra.mxu1 %v3927_v16  ;;  %v3977_v15 = vld [vmem:[#allocation8 + $0x88] sm:$0xff]   ;;  %v3979_v16 = vld [vmem:[#allocation8 + $0xd0] sm:$0xff]  }
 0x1c3   :  { %3415 = vmatprep.subr.bf16.mxu0 %v3928_v35  ;;  %3437 = vmatprep.subr.bf16.mxu1 %v3929_v17  ;;  %v3981_v35 = vld [vmem:[#allocation8 + $0x90] sm:$0xff]   ;;  %v3983_v17 = vld [vmem:[#allocation8 + $0xd8] sm:$0xff]  }
 0x1c6   :  { %3416 = vmatpush3.bf16.msra.mxu0 %v3930_v18  ;;  %3438 = vmatpush3.bf16.msra.mxu1 %v3931_v19  ;;  %v3985_v18 = vld [vmem:[#allocation8 + $0x98] sm:$0xff]   ;;  %v3987_v19 = vld [vmem:[#allocation8 + $0xe0] sm:$0xff]  }
 0x1c7   :  { %3417 = vmatprep.subr.bf16.mxu0 %v3932_v20  ;;  %3439 = vmatprep.subr.bf16.mxu1 %v3933_v23  ;;  %v3989_v20 = vld [vmem:[#allocation8 + $0xa0] sm:$0xff]   ;;  %v3991_v23 = vld [vmem:[#allocation8 + $0xe8] sm:$0xff]  }
 0x1ca   :  { %3418 = vmatpush3.bf16.msra.mxu0 %v3934_v24  ;;  %3440 = vmatpush3.bf16.msra.mxu1 %v3935_v25  ;;  %v3993_v24 = vld [vmem:[#allocation8 + $0xa8] sm:$0xff]   ;;  %v3996_v25 = vld [vmem:[#allocation8 + $0xf0] sm:$0xff]  }
 0x1cb   :  { %3419 = vmatprep.subr.bf16.mxu0 %v3936_v2  ;;  %3441 = vmatprep.subr.bf16.mxu1 %v3937_v10  ;;  %v3997_v2 = vld [vmem:[#allocation8 + $0x30] sm:$0xff]  }
 0x1cc   :  { %v3998_v10 = vld [vmem:[#allocation8 + $0xb0] sm:$0xff]  }
 0x1ce   :  { %3420 = vmatpush3.bf16.msra.mxu0 %v3938_v26  ;;  %3442 = vmatpush3.bf16.msra.mxu1 %v3939_v27  ;;  %v3999_v26 = vld [vmem:[#allocation8 + $0x78] sm:$0xff]  }
 0x1cf   :  { %3421 = vmatprep.subr.bf16.mxu0 %v3940_v28  ;;  %3443 = vmatprep.subr.bf16.mxu1 %v3941_v45  ;;  %v4000_v27 = vld [vmem:[#allocation8 + $0xf8] sm:$0xff]  }
 0x1d0   :  { %v4001_v28 = vld [vmem:[#allocation8 + $0x38] sm:$0xff]  }
 0x1d1   :  { %v4002_v45 = vld [vmem:[#allocation8 + $0xb8] sm:$0xff]  }
 0x1d2   :  { %3422 = vmatpush3.bf16.msra.mxu0 %v3942_v29  ;;  %3444 = vmatpush3.bf16.msra.mxu1 %v3943_v38  ;;  %v4350_v29 = vld [vmem:[%s4397_s4] sm:$0x1f] }
 0x1d3   :  { %3423 = vmatprep.subr.bf16.mxu0 %v3944_v30  ;;  %3445 = vmatprep.subr.bf16.mxu1 %v3945_v31  ;;  %v2564_v38 = vrot.slane %v4350_v29, %v4250_v34 }
 0x1d5   :  { %v2572_v30 = vcombine.high %v2564_v38, %v2564_v38  ;;  %v2579_v31 = vrot.slane %v2564_v38, %v4250_v34 }
 0x1d6   :  { %3424 = vmatpush3.bf16.msra.mxu0 %v3946_v32  ;;  %3446 = vmatpush3.bf16.msra.mxu1 %v3947_v33 }
 0x1d7   :  { %3425 = vmatprep.subr.bf16.mxu0 %v3948_v36  ;;  %3447 = vmatprep.subr.bf16.mxu1 %v3949_v37  ;;  %v2593_v32 = vrot.slane %v2572_v30, %v4250_v34  ;;  %v2594_v33 = vcombine.high %v2579_v31, %v2579_v31  ;;  %v2597_v37 = vpack.i.b16 %v2579_v31, %v2579_v31 }
 0x1d9   :  { %v2595_v36 = vcombine.high %v2593_v32, %v2593_v32 }
 0x1da   :  { %3426 = vmatpush3.bf16.msra.mxu0 %v3950_v39  ;;  %3448 = vmatpush3.bf16.msra.mxu1 %v3951_v40  ;;  %v2611_v39 = vpack.i.b16 %v2594_v33, %v2594_v33  ;;  %v2604_v40 = vpack.i.b16 %v2593_v32, %v2593_v32 }
 0x1db   :  { %3455 = vmatprep.subr.bf16.mxu0 %v3952_v41  ;;  %3539 = vmatprep.subr.bf16.mxu1 %v4140_v21  ;;  %v2618_v41 = vpack.i.b16 %v2595_v36, %v2595_v36 }
 0x1dd   :  { %2423 = vmatmul.mubr.bf16.vlgmr.msra.gmra.mrb[12].mxu0 %v4278_v6  ;;  %2463 = vmatmul.mubr.bf16.vlgmr.msra.gmra.mrb[12].mxu1 %v4309_v48  ;;  %v3960_v6 = vld [vmem:[#allocation7 + $0x6c8] ss:$20 sps:$4 sm:$0xff]   ;;  %v3972_v48 = vld [vmem:[#allocation8] sm:$0xff]  }
 0x1de   :  { %3456 = vmatpush3.bf16.msra.mxu0 %v3953_v42  ;;  %2502 = vmatprep.mubr.bf16.mxu0 %v4312_v52  ;;  %v3961_v52 = vld [vmem:[#allocation7 + $0x588] ss:$20 sps:$4 sm:$0xff]   ;;  %v2602_v42 = vrot.slane %v2597_v37, %v4262_v43 }
 0x1df   :  { %3540 = vmatpush3.bf16.msra.mxu1 %v3954_v55  ;;  %3457 = vmatprep.subr.bf16.mxu0 %v3955_v44  ;;  %v2616_v55 = vrot.slane %v2611_v39, %v4262_v43 }
 0x1e0   :  { %3541 = vmatprep.subr.bf16.mxu1 %v4140_v21  ;;  %3543 = vmatprep.mubr.msk.bf16.mxu1 %vm4141_vm2, %v4140_v21 }
 0x1e2   :  { %3458 = vmatpush3.bf16.msra.mxu0 %v3956_v46 }
 0x1e3   :  { %3542 = vmatpush3.bf16.msra.mxu1 %v3957_v47  ;;  %3459 = vmatprep.subr.bf16.mxu0 %v3958_v49  ;;  %v2609_v47 = vrot.slane %v2604_v40, %v4262_v43  ;;  %v2623_v49 = vrot.slane %v2618_v41, %v4262_v43 }
 0x1e4   :  { %3480 = vmatprep.subr.bf16.mxu1 %v3970_v50 }
 0x1e6   :  { %3544 = vmatmul.mubr.msk.bf16.vlgmr.msra.gmra.mrb[16].mxu1 %vm2058_vm3, %v4328_v22  ;;  %3460 = vmatpush3.bf16.msra.mxu0 %v3959_v13  ;;  %v3969_v22 = vld [vmem:[#allocation7 + $0x628] ss:$20 sps:$4 sm:$0xff]  }
 0x1e7   :  { %3461 = vmatprep.subr.bf16.mxu0 %v3960_v6  ;;  %3481 = vmatpush3.bf16.msra.mxu1 %v3972_v48 }
 0x1e8   :  { %3482 = vmatprep.subr.bf16.mxu1 %v3974_v51 }
 0x1ea   :  { %3462 = vmatpush3.bf16.msra.mxu0 %v3961_v52 }
 0x1eb   :  { %3463 = vmatprep.subr.bf16.mxu0 %v3962_v53  ;;  %3483 = vmatpush3.bf16.msra.mxu1 %v3976_v54 }
 0x1ec   :  { %3484 = vmatprep.subr.bf16.mxu1 %v3978_v56 }
 0x1ee   :  { %3464 = vmatpush3.bf16.msra.mxu0 %v3963_v57 }
 0x1ef   :  { %3465 = vmatprep.subr.bf16.mxu0 %v3964_v58  ;;  %3485 = vmatpush3.bf16.msra.mxu1 %v3980_v59 }
 0x1f0   :  { %3486 = vmatprep.subr.bf16.mxu1 %v3982_v60 }
 0x1f2   :  { %3466 = vmatpush3.bf16.msra.mxu0 %v3965_v61 }
 0x1f3   :  { %3467 = vmatprep.subr.bf16.mxu0 %v3966_v62  ;;  %3487 = vmatpush3.bf16.msra.mxu1 %v3984_v1 }
 0x1f4   :  { %3488 = vmatprep.subr.bf16.mxu1 %v3986_v3  ;;  %v4003_v3 = vld [vmem:[#allocation8 + $0x100] sm:$0xff]  }
 0x1f6   :  { %3468 = vmatpush3.bf16.msra.mxu0 %v3967_v4 }
 0x1f7   :  { %3469 = vmatprep.subr.bf16.mxu0 %v3968_v5  ;;  %3489 = vmatpush3.bf16.msra.mxu1 %v3988_v7  ;;  %v4004_v7 = vld [vmem:[#allocation8 + $0x108] sm:$0xff]  }
 0x1f8   :  { %3490 = vmatprep.subr.bf16.mxu1 %v3990_v8  ;;  %v4005_v8 = vld [vmem:[#allocation8 + $0x110] sm:$0xff]  }
 0x1fa   :  { %3470 = vmatpush3.bf16.msra.mxu0 %v3969_v22  ;;  %v4006_v22 = vld [vmem:[#allocation8 + $0x118] sm:$0xff]  }
 0x1fb   :  { %3502 = vmatprep.subr.bf16.mxu0 %v3971_v9  ;;  %3491 = vmatpush3.bf16.msra.mxu1 %v3992_v11  ;;  %v4007_v9 = vld [vmem:[#allocation8 + $0x120] sm:$0xff]   ;;  %v4008_v11 = vld [vmem:[#allocation8 + $0x128] ss:$0 sps:$4 sm:$0xff]  }
 0x1fd   :  { %2503 = vmatmul.mubr.bf16.vlgmr.msra.gmra.mrb[16].mxu0 %v4320_v63  ;;  %v3995_v63 = vld [vmem:[#allocation8 + $0x70] sm:$0xff]  }
 0x1fe   :  { %3503 = vmatpush3.bf16.msra.mxu0 %v3973_v12  ;;  %3492 = vmatprep.subr.bf16.mxu1 %v3995_v63  ;;  %v2953_v12 = vsel %vm153_vm0, %v4008_v11, 0 }
 0x1ff   :  { %3504 = vmatprep.subr.bf16.mxu0 %v3975_v14  ;;  %3493 = vmatpush3.bf16.msra.mxu1 %v3997_v2 }
 0x200   :  { %3494 = vmatprep.subr.bf16.mxu1 %v3999_v26 }
 0x202   :  { %3505 = vmatpush3.bf16.msra.mxu0 %v3977_v15 }
 0x203   :  { %3506 = vmatprep.subr.bf16.mxu0 %v3979_v16  ;;  %3495 = vmatpush3.bf16.msra.mxu1 %v4001_v28 }
 0x204   :  { %3547 = vmatprep.subr.bf16.mxu1 %v4140_v21 }
 0x206   :  { %3507 = vmatpush3.bf16.msra.mxu0 %v3981_v35 }
 0x207   :  { %3508 = vmatprep.subr.bf16.mxu0 %v3983_v17 }
 0x20a   :  { %3509 = vmatpush3.bf16.msra.mxu0 %v3985_v18 }
 0x20b   :  { %3510 = vmatprep.subr.bf16.mxu0 %v3987_v19 }
 0x20e   :  { %3511 = vmatpush3.bf16.msra.mxu0 %v3989_v20 }
 0x20f   :  { %3512 = vmatprep.subr.bf16.mxu0 %v3991_v23 }
 0x212   :  { %3513 = vmatpush3.bf16.msra.mxu0 %v3993_v24 }
 0x213   :  { %3514 = vmatprep.subr.bf16.mxu0 %v3996_v25 }
 0x216   :  { %3515 = vmatpush3.bf16.msra.mxu0 %v3998_v10 }
 0x217   :  { %3516 = vmatprep.subr.bf16.mxu0 %v4000_v27 }
 0x21a   :  { %3517 = vmatpush3.bf16.msra.mxu0 %v4002_v45 }
 0x290   :  { %v2219_v44 = vpop.f32.mrb[8].mxu0  ;;  %v2383_v46 = vpop.f32.mrb[8].mxu1 }
 0x291   :  { %v2550_v50 = vpack.c.bf16 %v2219_v44, %v2219_v44  ;;  %v2552_v13 = vpack.c.bf16 %v2383_v46, %v2383_v46  ;;  %v2221_v6 = vpop.f32.mrb[9].mxu0  ;;  %v2385_v48 = vpop.f32.mrb[9].mxu1 }
 0x292   :  { %v2551_v51 = vpack.c.bf16 %v2221_v6, %v2221_v6  ;;  %v2553_v52 = vpack.c.bf16 %v2385_v48, %v2385_v48  ;;  %v2223_v53 = vpop.f32.mrb[10].mxu0  ;;  %v2387_v54 = vpop.f32.mrb[10].mxu1 }
 0x293   :  { %v2631_v56 = vadd.bf16 %v2602_v42, %v2550_v50  ;;  %v2633_v57 = vadd.bf16 %v2616_v55, %v2552_v13  ;;  %v2224_v58 = vpop.f32.mrb[11].mxu0  ;;  %v2388_v59 = vpop.f32.mrb[11].mxu1 }
 0x294   :  { %v2632_v60 = vadd.bf16 %v2609_v47, %v2551_v51  ;;  %v2634_v61 = vadd.bf16 %v2623_v49, %v2553_v52 }
 0x295   :  { %v2636_v4 = vmax.bf16 %v4139_v0, %v2631_v56  ;;  %v2638_v5 = vmax.bf16 %v4139_v0, %v2633_v57 }
 0x296   :  { %v2637_v62 = vmax.bf16 %v4139_v0, %v2632_v60  ;;  %v2639_v1 = vmax.bf16 %v4139_v0, %v2634_v61 }
 0x298   :  { %2987 = vmatprep.mubr.bf16.mxu1 %v2637_v62  ;;  %3027 = vmatprep.mubr.bf16.mxu0 %v2639_v1 }
 0x299   :  { %2988 = vmatmul.mubr.bf16.vlgmr.msra.gmra.mrb[20].mxu1 %v2636_v4  ;;  %3028 = vmatmul.mubr.bf16.vlgmr.msra.gmra.mrb[20].mxu0 %v2638_v5 }
 0x29a   :  { %3548 = vmatpush3.bf16.msra.mxu1 %v4003_v3  ;;  %3559 = vmatprep.mubr.msk.bf16.mxu1 %vm4141_vm2, %v4140_v21 }
 0x29b   :  { %3549 = vmatprep.subr.bf16.mxu1 %v4140_v21 }
 0x29e   :  { %3550 = vmatpush3.bf16.msra.mxu1 %v4004_v7 }
 0x29f   :  { %3551 = vmatprep.subr.bf16.mxu1 %v4140_v21 }
 0x2a2   :  { %3552 = vmatpush3.bf16.msra.mxu1 %v4005_v8 }
 0x2a3   :  { %3553 = vmatprep.subr.bf16.mxu1 %v4140_v21 }
 0x2a6   :  { %3554 = vmatpush3.bf16.msra.mxu1 %v4006_v22 }
 0x2a7   :  { %3555 = vmatprep.subr.bf16.mxu1 %v4140_v21 }
 0x2aa   :  { %3556 = vmatpush3.bf16.msra.mxu1 %v4007_v9 }
 0x2ab   :  { %3557 = vmatprep.subr.bf16.mxu1 %v4140_v21  ;;  %v2557_v21 = vcombine.high %v4350_v29, %v4350_v29 }
 0x2ad   :  { %v2571_v27 = vrot.slane %v2557_v21, %v4250_v34 }
 0x2ae   :  { %3558 = vmatpush3.bf16.msra.mxu1 %v2953_v12 }
 0x2af   :  { %v2586_v28 = vrot.slane %v2571_v27, %v4250_v34  ;;  %v3368_v34 = vld [vmem:[%s4399_s6] ss:$0 sm:$0xff]  ;;  %s4099_s6 = scalar_lea.vmem %s3084_s9, 128 }
 0x2b0   :  { %v3427_v14 = vpop.f32.mrb[12].mxu0  ;;  %v3449_v15 = vpop.f32.mrb[12].mxu1  ;;  %p4100_p4 = scmp.ne.s32.totalorder %s3084_s9, %s4099_s6  ;;  %p4105_p6 = scmp.lt.s32.totalorder %s4099_s6, %s4099_s6 }
 0x2b1   :  { %v3428_v16 = vpop.f32.mrb[13].mxu0  ;;  %v3450_v35 = vpop.f32.mrb[13].mxu1  ;;  %v2625_v31 = vpack.i.b16 %v2586_v28, %v2586_v28 }
 0x2b2   :  { %v3429_v17 = vadd.f32 %v3428_v16, %v3427_v14  ;;  %v3451_v18 = vadd.f32 %v3450_v35, %v3449_v15  ;;  %v3430_v19 = vpop.f32.mrb[14].mxu0  ;;  %v3452_v20 = vpop.f32.mrb[14].mxu1  ;;  %p4106_p7 = por %p4105_p6, %p4104_p5 }
 0x2b3   :  { %v3431_v23 = vpop.f32.mrb[15].mxu0  ;;  %v3453_v24 = vpop.f32.mrb[15].mxu1  ;;  %v2630_v39 = vrot.slane %v2625_v31, %v4262_v43 }
 0x2b4   :  { %v2465_v63 = vadd.f32 %v3451_v18, %v3429_v17  ;;  %p4107_p8 = pnand %p4106_p7, %p4100_p4 }
 0x2b9   :  { %v2544_v25 = vpop.f32.mrb[16].mxu1 }
 0x2ba   :  { %v3545_v2 = vpop.f32.mrb[17].mxu1 }
 0x2bb   :  { %v2547_v10 = vpop.f32.mrb[18].mxu1 }
 0x2bc   :  { %v3546_v26 = vpop.f32.mrb[19].mxu1 }
 0x2d0   :  { %v3471_v45 = vpop.f32.mrb[16].mxu0 }
 0x2d1   :  { %v3472_v38 = vpop.f32.mrb[17].mxu0 }
 0x2d2   :  { %v3473_v30 = vadd.f32 %v3472_v38, %v3471_v45  ;;  %v3474_v32 = vpop.f32.mrb[18].mxu0 }
 0x2d3   :  { %v3475_v33 = vpop.f32.mrb[19].mxu0 }
 0x2d4   :  { %v2505_v36 = vadd.f32 %v3473_v30, %v2465_v63 }
 0x2d6   :  { %v2545_v37 = vadd.f32 %v2544_v25, %v2505_v36 }
 0x2d8   :  { %v2554_v40 = vpack.c.bf16 %v2545_v37, %v2545_v37 }
 0x2da   :  { %v2635_v41 = vadd.bf16 %v2630_v39, %v2554_v40 }
 0x2dc   :  { %v2640_v42 = vmax.bf16 %v4139_v0, %v2635_v41 }
 0x2de   :  { %3560 = vmatmul.mubr.msk.bf16.vlgmr.msra.gmra.mrb[24].mxu1 %vm2948_vm4, %v2640_v42 }
 0x36c   :  { %v3496_v29 = vpop.f32.mrb[20].mxu1  ;;  %v3518_v55 = vpop.f32.mrb[20].mxu0 }
 0x36d   :  { %v3497_v44 = vpop.f32.mrb[21].mxu1  ;;  %v3519_v46 = vpop.f32.mrb[21].mxu0 }
 0x36e   :  { %v3498_v47 = vadd.f32 %v3497_v44, %v3496_v29  ;;  %v3520_v49 = vadd.f32 %v3519_v46, %v3518_v55  ;;  %v3499_v50 = vpop.f32.mrb[22].mxu1  ;;  %v3521_v13 = vpop.f32.mrb[22].mxu0 }
 0x36f   :  { %v3500_v6 = vpop.f32.mrb[23].mxu1  ;;  %v3522_v43 = vpop.f32.mrb[23].mxu0 }
 0x370   :  { %v2990_v48 = vadd.f32 %v3498_v47, %v3368_v34 }
 0x372   :  { %v3030_v51 = vadd.f32 %v3520_v49, %v2990_v48 }
 0x3b1   :  { %v3069_v52 = vpop.f32.mrb[24].mxu1 }
 0x3b2   :  { %v3070_v53 = vadd.f32 %v3069_v52, %v3030_v51  ;;  %v3561_v0 = vpop.f32.mrb[25].mxu1 }
 0x3b3   :  { %v3072_v54 = vpop.f32.mrb[26].mxu1 }
 0x3b4   :  { %4009 = vtanh.f32 %v3070_v53  ;;  %v3562_v56 = vpop.f32.mrb[27].mxu1 }
 0x3be   :  { %v4010_v57 = vpop.eup %4009 }
 0x3bf   :  { %3076 = vst [vmem:[#allocation10] sm:$0xff] %v4010_v57 }
 0x3c0   :  { %4110 = shalt.err (!%p4107_p8)
}
 0x3c1   :  { %s4111_s12 = scalar_lea.hbm %s4400_s7, 128 }
 0x3c2   :  { %p4112_p9 = scmp.ne.s32.totalorder %s4400_s7, %s4111_s12  ;;  %p4115_p10 = scmp.lt.u32.totalorder %s4111_s12, %s4400_s7 }
 0x3c4   :  { %p4117_p11 = pnand %p4115_p10, %p4112_p9 }
 0x3c6   :  { %4120 = shalt.err (!%p4117_p11)
}
 0x3c7   :  { %3086 = dma.vmem_to_hbm [thread:$0]  %s3084_s9, 128, %s4400_s7, [#allocation4]  }
 0x3c8   :  { %4127 = dma.done.wait [#allocation4], 128  }
 0x3c9   :  { %4128 = vsyncadd [#allocation4], 4294967168 }
 0x3ca   :  { %3090 = vsyncpa [#allocation3], 1 }
 0x3cb   :  { %3091 = vsyncpa [#allocation6], 1 }
 0x3cc   :  { %3092 = vsyncpa [#allocation9], 1 }
 0x3cd   :  { %3093 = vsyncpa [#allocation4], 1 }

</bundles_post_ra>
